<compile_context>
chip_gen: v6e
topology: v6e:2x2x1
jax: 0.10.0
libtpu: 0.0.40
codegen_flags: <defaults>
</compile_context>

<pallas_src>
import functools

import jax
import jax.numpy as jnp
from jax.experimental import pallas as pl
from jax.experimental.pallas import tpu as pltpu

EPS = 1e-5  # nn.InstanceNorm2d default eps (affine=False, biased variance)


def _instance_norm(a, bb, h, c):
    """Per-image InstanceNorm2d on a lane-folded (bb*h, W*C) activation.

    The channel of lane l is (l % c).  Sublane reduce over H per image, then a
    stride-c circular lane reduction on the XLU; sum and sum-of-squares are
    packed into one array so a single roll chain reduces both.  After the rolls
    every lane already holds its own channel's statistic (no broadcast needed).
    """
    m, wc = a.shape
    w = wc // c
    ar = a.reshape(bb, h, wc)
    s1 = jnp.sum(ar, axis=1)                        # (bb, wc)
    s2 = jnp.sum(ar * ar, axis=1)                   # (bb, wc)
    s = jnp.concatenate([s1, s2], axis=0)           # (2*bb, wc): one roll chain
    shift = c
    while shift < wc:                               # requires W = power of two
        s = s + pltpu.roll(s, shift=shift, axis=1)
        shift *= 2
    inv_n = 1.0 / (h * w)
    mean = s[:bb] * inv_n                           # (bb, wc)
    var = s[bb:] * inv_n - mean * mean              # one-pass biased variance
    scale = jax.lax.rsqrt(var + EPS)
    out = (ar - mean[:, None, :]) * scale[:, None, :]
    return out.reshape(m, wc)


def _conv3x3(act, w_cat, not_first_row, not_last_row):
    """SAME 3x3 conv as a single (M, 3*WC) x (3*WC, WC) bf16 MXU matmul.

    Row taps (kh) come from XLU rolls + border masks; width taps / zero padding
    are folded into the banded weights.  Accumulation is f32.
    """
    m = act.shape[0]
    down = jnp.where(not_first_row, pltpu.roll(act, shift=1, axis=0), 0.0)
    up = jnp.where(not_last_row, pltpu.roll(act, shift=m - 1, axis=0), 0.0)
    lhs = jnp.concatenate(
        [down.astype(jnp.bfloat16), act.astype(jnp.bfloat16),
         up.astype(jnp.bfloat16)], axis=1)          # (M, 3*WC) bf16
    return jnp.dot(lhs, w_cat, preferred_element_type=jnp.float32)


def _resblocks_kernel(x_ref, w1_ref, w2_ref, out_ref, *, num_blocks, c):
    # x_ref   : (BB, H, W*C) f32   lane-folded images for this grid step
    # w1_ref  : (NB, 3*W*C, W*C) bf16   kh-stacked banded conv1 weights
    # w2_ref  : (NB, 3*W*C, W*C) bf16   kh-stacked banded conv2 weights
    # out_ref : (BB, H, W*C) f32
    bb, h, wc = out_ref.shape
    m = bb * h

    cur = x_ref[...].reshape(m, wc)                 # running activation / residual

    # Border-row masks, hoisted above the block loop (per-image row index).
    row_in_img = jax.lax.broadcasted_iota(jnp.int32, (m, wc), 0) % h
    not_first_row = row_in_img >= 1                 # zero the r-1 tap at r == 0
    not_last_row = row_in_img <= h - 2              # zero the r+1 tap at r == H-1

    # TODO(synk): switch to lax.fori_loop over blocks (dynamic w_ref[blk]) once
    # num_blocks grows enough for the unrolled loop to hurt vreg pressure.
    for blk in range(num_blocks):
        y = _conv3x3(cur, w1_ref[blk], not_first_row, not_last_row)
        y = _instance_norm(y, bb, h, c)
        y = jnp.maximum(y, 0.0)
        y = _conv3x3(y, w2_ref[blk], not_first_row, not_last_row)
        y = _instance_norm(y, bb, h, c)
        cur = cur + y                               # residual add

    out_ref[...] = cur.reshape(bb, h, wc)


def _band_cat(w, width):
    """(3, 3, C, C) HWIO conv weight -> (3*W*C, W*C) kh-stacked banded weight.

    band_kh[wi*C+ci, wo*C+co] = w[kh, wi-wo+1, ci, co] (zero outside the band),
    so a SAME-padded 3x3 conv becomes ONE (M x 3WC)(3WC x WC) matmul; width
    zero-padding is realized by band truncation.
    """
    bands = []
    for kh in range(3):
        b = sum(jnp.kron(jnp.eye(width, k=1 - kw, dtype=w.dtype), w[kh, kw])
                for kw in range(3))
        bands.append(b)
    return jnp.concatenate(bands, axis=0)


def resblocks(x, params, *, images_per_step=None):
    """x: (B, H, W, C) float32 NHWC.  params: list of (w1, b1, w2, b2) per
    ResBlock with w* in HWIO (3, 3, C, C) and b* of shape (C,).

    Biases are accepted for interface parity but never sent to the kernel:
    a per-channel bias immediately followed by affine-free InstanceNorm cancels
    exactly, so it cannot affect the output.
    """
    B, H, W, C = x.shape
    WC = W * C
    assert W & (W - 1) == 0, "W must be a power of two (roll-based reduction)"
    NB = len(params)

    if images_per_step is None:
        images_per_step = min(B, 4)
    BB = images_per_step
    assert B % BB == 0, "batch must be divisible by images_per_step"

    # Host-side weight prep (once per call): banded + kh-stacked, stored bf16.
    w1 = jnp.stack([_band_cat(p[0], W) for p in params]).astype(jnp.bfloat16)
    w2 = jnp.stack([_band_cat(p[2], W) for p in params]).astype(jnp.bfloat16)

    x_flat = x.reshape(B, H, WC)  # lane-dense: last dim = W*C (=128 here)

    kernel = functools.partial(_resblocks_kernel, num_blocks=NB, c=C)

    grid_spec = pltpu.PrefetchScalarGridSpec(
        num_scalar_prefetch=0,
        grid=(B // BB,),
        in_specs=[
            pl.BlockSpec((BB, H, WC), lambda b: (b, 0, 0)),             # x
            # Constant index_map -> weights DMA'd once per core.
            pl.BlockSpec((NB, 3 * WC, WC), lambda b: (0, 0, 0)),        # w1 bands
            pl.BlockSpec((NB, 3 * WC, WC), lambda b: (0, 0, 0)),        # w2 bands
        ],
        out_specs=pl.BlockSpec((BB, H, WC), lambda b: (b, 0, 0)),
    )

    out_flat = pl.pallas_call(
        kernel,
        out_shape=jax.ShapeDtypeStruct((B, H, WC), jnp.float32),
        grid_spec=grid_spec,
        compiler_params=pltpu.CompilerParams(
            dimension_semantics=("parallel",)),
    )(x_flat, w1, w2)

    return out_flat.reshape(B, H, W, C)


def resblocks_reference(x, params):
    """Pure-JAX f32 reference (NHWC / HWIO) matching the PyTorch ResBlocks
    forward, including the (mathematically dead) conv biases."""
    def conv(h, w, b):
        y = jax.lax.conv_general_dilated(
            h, w, window_strides=(1, 1), padding="SAME",
            dimension_numbers=("NHWC", "HWIO", "NHWC"),
            precision=jax.lax.Precision.HIGHEST)
        return y + b.reshape(1, 1, 1, -1)

    def inorm(y):
        mean = jnp.mean(y, axis=(1, 2), keepdims=True)
        var = jnp.var(y, axis=(1, 2), keepdims=True)  # biased, like InstanceNorm2d
        return (y - mean) / jnp.sqrt(var + EPS)

    out = x
    for (w1, b1, w2, b2) in params:
        h = jnp.maximum(inorm(conv(out, w1, b1)), 0.0)
        h = inorm(conv(h, w2, b2))
        out = h + out
    return out


if __name__ == "__main__":
    NUM_BLOCKS = 2
    B, C, H, W = 8, 8, 16, 16   # dim=8, nz=0  ->  W*C = 128 (fully lane-dense)

    key = jax.random.PRNGKey(0)
    keys = jax.random.split(key, 1 + 4 * NUM_BLOCKS)

    # NHWC input (equivalent to NCHW [B, C, H, W] in the PyTorch module)
    x = jax.random.normal(keys[0], (B, H, W, C), dtype=jnp.float32)

    params = []
    for i in range(NUM_BLOCKS):
        kw1, kb1, kw2, kb2 = keys[1 + 4 * i: 5 + 4 * i]
        # Round conv weights to bf16-representable values so the kernel's bf16
        # weight path is exact w.r.t. the f32 reference (only the in-kernel
        # bf16 activation cast differs; covered by the tolerance below).
        w1 = (0.1 * jax.random.normal(kw1, (3, 3, C, C), jnp.float32)
              ).astype(jnp.bfloat16).astype(jnp.float32)
        w2 = (0.1 * jax.random.normal(kw2, (3, 3, C, C), jnp.float32)
              ).astype(jnp.bfloat16).astype(jnp.float32)
        b1 = 0.1 * jax.random.normal(kb1, (C,), jnp.float32)
        b2 = 0.1 * jax.random.normal(kb2, (C,), jnp.float32)
        params.append((w1, b1, w2, b2))

    out = jax.block_until_ready(resblocks(x, params, images_per_step=4))

    ref = resblocks_reference(x, params)
    assert out.shape == (B, H, W, C)
    # bf16 matmul activations vs. f32 reference -> moderate tolerance.
    assert jnp.allclose(out, ref, atol=3e-2, rtol=3e-2), "mismatch vs reference"

    print("KERNEL_OK")
</pallas_src>

<mosaic_0001>
module attributes {stable_mosaic.version = 11 : i64} {
  func.func @_resblocks_kernel(%arg0: i32, %arg1: memref<4x16x128xf32, #tpu.memory_space<vmem>>, %arg2: memref<2x384x128xbf16, #tpu.memory_space<vmem>>, %arg3: memref<2x384x128xbf16, #tpu.memory_space<vmem>>, %arg4: memref<4x16x128xf32, #tpu.memory_space<vmem>>) attributes {dimension_semantics = [#tpu.dimension_semantics<parallel>], iteration_bounds = array<i64: 2>, scalar_prefetch = 0 : i64, scratch_operands = 0 : i64, tpu.core_type = #tpu.core_type<tc>, window_params = [{transform_indices = @transform_0, window_bounds = array<i64: 4, 16, 128>}, {pipeline_mode = #tpu.pipeline_mode<synchronous>, transform_indices = @transform_1, window_bounds = array<i64: 2, 384, 128>}, {pipeline_mode = #tpu.pipeline_mode<synchronous>, transform_indices = @transform_2, window_bounds = array<i64: 2, 384, 128>}, {transform_indices = @transform_3, window_bounds = array<i64: 4, 16, 128>}]} {
    %c0 = arith.constant 0 : index
    %c0_0 = arith.constant 0 : index
    %c0_1 = arith.constant 0 : index
    %0 = vector.load %arg1[%c0, %c0_0, %c0_1] : memref<4x16x128xf32, #tpu.memory_space<vmem>>, vector<4x16x128xf32>
    %1 = vector.shape_cast %0 : vector<4x16x128xf32> to vector<64x128xf32>
    %2 = tpu.iota {dimensions = array<i32: 0>} : vector<64x128xi32>
    %c16_i32 = arith.constant 16 : i32
    %c0_i32 = arith.constant 0 : i32
    %3 = arith.cmpi eq, %c16_i32, %c0_i32 : i32
    %c1_i32 = arith.constant 1 : i32
    %4 = arith.select %3, %c1_i32, %c16_i32 : i32
    %5 = vector.broadcast %4 : i32 to vector<64x128xi32>
    %6 = arith.remsi %2, %5 : vector<64x128xi32>
    %c0_i32_2 = arith.constant 0 : i32
    %7 = vector.broadcast %c0_i32_2 : i32 to vector<64x128xi32>
    %8 = arith.cmpi ne, %6, %7 : vector<64x128xi32>
    %c0_i32_3 = arith.constant 0 : i32
    %9 = vector.broadcast %c0_i32_3 : i32 to vector<64x128xi32>
    %10 = arith.cmpi slt, %6, %9 : vector<64x128xi32>
    %c0_i32_4 = arith.constant 0 : i32
    %11 = arith.cmpi slt, %4, %c0_i32_4 : i32
    %12 = vector.broadcast %11 : i1 to vector<64x128xi1>
    %13 = vector.broadcast %12 : vector<64x128xi1> to vector<64x128xi1>
    %14 = arith.xori %10, %13 : vector<64x128xi1>
    %15 = arith.andi %14, %8 : vector<64x128xi1>
    %16 = vector.broadcast %4 : i32 to vector<64x128xi32>
    %17 = arith.addi %6, %16 : vector<64x128xi32>
    %18 = arith.select %15, %17, %6 : vector<64x128xi1>, vector<64x128xi32>
    %c1_i32_5 = arith.constant 1 : i32
    %19 = vector.broadcast %c1_i32_5 : i32 to vector<64x128xi32>
    %20 = arith.cmpi sge, %18, %19 : vector<64x128xi32>
    %c14_i32 = arith.constant 14 : i32
    %21 = vector.broadcast %c14_i32 : i32 to vector<64x128xi32>
    %22 = arith.cmpi sle, %18, %21 : vector<64x128xi32>
    %c0_6 = arith.constant 0 : index
    %c0_7 = arith.constant 0 : index
    %c0_8 = arith.constant 0 : index
    %23 = vector.load %arg2[%c0_6, %c0_7, %c0_8] : memref<2x384x128xbf16, #tpu.memory_space<vmem>>, vector<1x384x128xbf16>
    %24 = vector.shape_cast %23 : vector<1x384x128xbf16> to vector<384x128xbf16>
    %c1_i32_9 = arith.constant 1 : i32
    %25 = tpu.dynamic_rotate %1 by %c1_i32_9 dim 0 : vector<64x128xf32>, i32 -> vector<64x128xf32>
    %cst = arith.constant 0.000000e+00 : f32
    %26 = vector.broadcast %cst : f32 to vector<64x128xf32>
    %27 = arith.select %20, %25, %26 : vector<64x128xi1>, vector<64x128xf32>
    %c63_i32 = arith.constant 63 : i32
    %28 = tpu.dynamic_rotate %1 by %c63_i32 dim 0 : vector<64x128xf32>, i32 -> vector<64x128xf32>
    %cst_10 = arith.constant 0.000000e+00 : f32
    %29 = vector.broadcast %cst_10 : f32 to vector<64x128xf32>
    %30 = arith.select %22, %28, %29 : vector<64x128xi1>, vector<64x128xf32>
    %31 = arith.truncf %27 : vector<64x128xf32> to vector<64x128xbf16>
    %32 = arith.truncf %1 : vector<64x128xf32> to vector<64x128xbf16>
    %33 = arith.truncf %30 : vector<64x128xf32> to vector<64x128xbf16>
    %34 = tpu.concatenate %31, %32, %33 in 1 : vector<64x128xbf16>, vector<64x128xbf16>, vector<64x128xbf16> -> vector<64x384xbf16>
    %cst_11 = arith.constant dense<0.000000e+00> : vector<64x128xf32>
    %35 = tpu.matmul %34, %24, %cst_11 {dimension_numbers = #tpu.dot_dimension_numbers<[1], [0], [0], [1], [0, 0, 1, 1], [], []>} : vector<64x384xbf16>, vector<384x128xbf16>, vector<64x128xf32> -> vector<64x128xf32>
    %36 = vector.shape_cast %35 : vector<64x128xf32> to vector<4x16x128xf32>
    %cst_12 = arith.constant dense<0.000000e+00> : vector<4x128xf32>
    %37 = vector.multi_reduction <add>, %36, %cst_12 [1] : vector<4x16x128xf32> to vector<4x128xf32>
    %38 = arith.mulf %36, %36 : vector<4x16x128xf32>
    %cst_13 = arith.constant dense<0.000000e+00> : vector<4x128xf32>
    %39 = vector.multi_reduction <add>, %38, %cst_13 [1] : vector<4x16x128xf32> to vector<4x128xf32>
    %40 = tpu.concatenate %37, %39 in 0 : vector<4x128xf32>, vector<4x128xf32> -> vector<8x128xf32>
    %c8_i32 = arith.constant 8 : i32
    %41 = tpu.dynamic_rotate %40 by %c8_i32 dim 1 : vector<8x128xf32>, i32 -> vector<8x128xf32>
    %42 = arith.addf %40, %41 : vector<8x128xf32>
    %c16_i32_14 = arith.constant 16 : i32
    %43 = tpu.dynamic_rotate %42 by %c16_i32_14 dim 1 : vector<8x128xf32>, i32 -> vector<8x128xf32>
    %44 = arith.addf %42, %43 : vector<8x128xf32>
    %c32_i32 = arith.constant 32 : i32
    %45 = tpu.dynamic_rotate %44 by %c32_i32 dim 1 : vector<8x128xf32>, i32 -> vector<8x128xf32>
    %46 = arith.addf %44, %45 : vector<8x128xf32>
    %c64_i32 = arith.constant 64 : i32
    %47 = tpu.dynamic_rotate %46 by %c64_i32 dim 1 : vector<8x128xf32>, i32 -> vector<8x128xf32>
    %48 = arith.addf %46, %47 : vector<8x128xf32>
    %49 = vector.extract_strided_slice %48 {offsets = [0, 0], sizes = [4, 128], strides = [1, 1]} : vector<8x128xf32> to vector<4x128xf32>
    %cst_15 = arith.constant 3.906250e-03 : f32
    %50 = vector.broadcast %cst_15 : f32 to vector<4x128xf32>
    %51 = arith.mulf %49, %50 : vector<4x128xf32>
    %52 = vector.extract_strided_slice %48 {offsets = [4, 0], sizes = [4, 128], strides = [1, 1]} : vector<8x128xf32> to vector<4x128xf32>
    %cst_16 = arith.constant 3.906250e-03 : f32
    %53 = vector.broadcast %cst_16 : f32 to vector<4x128xf32>
    %54 = arith.mulf %52, %53 : vector<4x128xf32>
    %55 = arith.mulf %51, %51 : vector<4x128xf32>
    %56 = arith.subf %54, %55 : vector<4x128xf32>
    %cst_17 = arith.constant 9.99999974E-6 : f32
    %57 = vector.broadcast %cst_17 : f32 to vector<4x128xf32>
    %58 = arith.addf %56, %57 : vector<4x128xf32>
    %59 = math.rsqrt %58 : vector<4x128xf32>
    %60 = vector.shape_cast %51 : vector<4x128xf32> to vector<4x1x128xf32>
    %61 = vector.broadcast %60 : vector<4x1x128xf32> to vector<4x16x128xf32>
    %62 = arith.subf %36, %61 : vector<4x16x128xf32>
    %63 = vector.shape_cast %59 : vector<4x128xf32> to vector<4x1x128xf32>
    %64 = vector.broadcast %63 : vector<4x1x128xf32> to vector<4x16x128xf32>
    %65 = arith.mulf %62, %64 : vector<4x16x128xf32>
    %66 = vector.shape_cast %65 : vector<4x16x128xf32> to vector<64x128xf32>
    %cst_18 = arith.constant 0.000000e+00 : f32
    %67 = vector.broadcast %cst_18 : f32 to vector<64x128xf32>
    %68 = arith.maximumf %66, %67 : vector<64x128xf32>
    %c0_19 = arith.constant 0 : index
    %c0_20 = arith.constant 0 : index
    %c0_21 = arith.constant 0 : index
    %69 = vector.load %arg3[%c0_19, %c0_20, %c0_21] : memref<2x384x128xbf16, #tpu.memory_space<vmem>>, vector<1x384x128xbf16>
    %70 = vector.shape_cast %69 : vector<1x384x128xbf16> to vector<384x128xbf16>
    %c1_i32_22 = arith.constant 1 : i32
    %71 = tpu.dynamic_rotate %68 by %c1_i32_22 dim 0 : vector<64x128xf32>, i32 -> vector<64x128xf32>
    %cst_23 = arith.constant 0.000000e+00 : f32
    %72 = vector.broadcast %cst_23 : f32 to vector<64x128xf32>
    %73 = arith.select %20, %71, %72 : vector<64x128xi1>, vector<64x128xf32>
    %c63_i32_24 = arith.constant 63 : i32
    %74 = tpu.dynamic_rotate %68 by %c63_i32_24 dim 0 : vector<64x128xf32>, i32 -> vector<64x128xf32>
    %cst_25 = arith.constant 0.000000e+00 : f32
    %75 = vector.broadcast %cst_25 : f32 to vector<64x128xf32>
    %76 = arith.select %22, %74, %75 : vector<64x128xi1>, vector<64x128xf32>
    %77 = arith.truncf %73 : vector<64x128xf32> to vector<64x128xbf16>
    %78 = arith.truncf %68 : vector<64x128xf32> to vector<64x128xbf16>
    %79 = arith.truncf %76 : vector<64x128xf32> to vector<64x128xbf16>
    %80 = tpu.concatenate %77, %78, %79 in 1 : vector<64x128xbf16>, vector<64x128xbf16>, vector<64x128xbf16> -> vector<64x384xbf16>
    %cst_26 = arith.constant dense<0.000000e+00> : vector<64x128xf32>
    %81 = tpu.matmul %80, %70, %cst_26 {dimension_numbers = #tpu.dot_dimension_numbers<[1], [0], [0], [1], [0, 0, 1, 1], [], []>} : vector<64x384xbf16>, vector<384x128xbf16>, vector<64x128xf32> -> vector<64x128xf32>
    %82 = vector.shape_cast %81 : vector<64x128xf32> to vector<4x16x128xf32>
    %cst_27 = arith.constant dense<0.000000e+00> : vector<4x128xf32>
    %83 = vector.multi_reduction <add>, %82, %cst_27 [1] : vector<4x16x128xf32> to vector<4x128xf32>
    %84 = arith.mulf %82, %82 : vector<4x16x128xf32>
    %cst_28 = arith.constant dense<0.000000e+00> : vector<4x128xf32>
    %85 = vector.multi_reduction <add>, %84, %cst_28 [1] : vector<4x16x128xf32> to vector<4x128xf32>
    %86 = tpu.concatenate %83, %85 in 0 : vector<4x128xf32>, vector<4x128xf32> -> vector<8x128xf32>
    %c8_i32_29 = arith.constant 8 : i32
    %87 = tpu.dynamic_rotate %86 by %c8_i32_29 dim 1 : vector<8x128xf32>, i32 -> vector<8x128xf32>
    %88 = arith.addf %86, %87 : vector<8x128xf32>
    %c16_i32_30 = arith.constant 16 : i32
    %89 = tpu.dynamic_rotate %88 by %c16_i32_30 dim 1 : vector<8x128xf32>, i32 -> vector<8x128xf32>
    %90 = arith.addf %88, %89 : vector<8x128xf32>
    %c32_i32_31 = arith.constant 32 : i32
    %91 = tpu.dynamic_rotate %90 by %c32_i32_31 dim 1 : vector<8x128xf32>, i32 -> vector<8x128xf32>
    %92 = arith.addf %90, %91 : vector<8x128xf32>
    %c64_i32_32 = arith.constant 64 : i32
    %93 = tpu.dynamic_rotate %92 by %c64_i32_32 dim 1 : vector<8x128xf32>, i32 -> vector<8x128xf32>
    %94 = arith.addf %92, %93 : vector<8x128xf32>
    %95 = vector.extract_strided_slice %94 {offsets = [0, 0], sizes = [4, 128], strides = [1, 1]} : vector<8x128xf32> to vector<4x128xf32>
    %cst_33 = arith.constant 3.906250e-03 : f32
    %96 = vector.broadcast %cst_33 : f32 to vector<4x128xf32>
    %97 = arith.mulf %95, %96 : vector<4x128xf32>
    %98 = vector.extract_strided_slice %94 {offsets = [4, 0], sizes = [4, 128], strides = [1, 1]} : vector<8x128xf32> to vector<4x128xf32>
    %cst_34 = arith.constant 3.906250e-03 : f32
    %99 = vector.broadcast %cst_34 : f32 to vector<4x128xf32>
    %100 = arith.mulf %98, %99 : vector<4x128xf32>
    %101 = arith.mulf %97, %97 : vector<4x128xf32>
    %102 = arith.subf %100, %101 : vector<4x128xf32>
    %cst_35 = arith.constant 9.99999974E-6 : f32
    %103 = vector.broadcast %cst_35 : f32 to vector<4x128xf32>
    %104 = arith.addf %102, %103 : vector<4x128xf32>
    %105 = math.rsqrt %104 : vector<4x128xf32>
    %106 = vector.shape_cast %97 : vector<4x128xf32> to vector<4x1x128xf32>
    %107 = vector.broadcast %106 : vector<4x1x128xf32> to vector<4x16x128xf32>
    %108 = arith.subf %82, %107 : vector<4x16x128xf32>
    %109 = vector.shape_cast %105 : vector<4x128xf32> to vector<4x1x128xf32>
    %110 = vector.broadcast %109 : vector<4x1x128xf32> to vector<4x16x128xf32>
    %111 = arith.mulf %108, %110 : vector<4x16x128xf32>
    %112 = vector.shape_cast %111 : vector<4x16x128xf32> to vector<64x128xf32>
    %113 = arith.addf %1, %112 : vector<64x128xf32>
    %c1 = arith.constant 1 : index
    %c0_36 = arith.constant 0 : index
    %c0_37 = arith.constant 0 : index
    %114 = vector.load %arg2[%c1, %c0_36, %c0_37] : memref<2x384x128xbf16, #tpu.memory_space<vmem>>, vector<1x384x128xbf16>
    %115 = vector.shape_cast %114 : vector<1x384x128xbf16> to vector<384x128xbf16>
    %c1_i32_38 = arith.constant 1 : i32
    %116 = tpu.dynamic_rotate %113 by %c1_i32_38 dim 0 : vector<64x128xf32>, i32 -> vector<64x128xf32>
    %cst_39 = arith.constant 0.000000e+00 : f32
    %117 = vector.broadcast %cst_39 : f32 to vector<64x128xf32>
    %118 = arith.select %20, %116, %117 : vector<64x128xi1>, vector<64x128xf32>
    %c63_i32_40 = arith.constant 63 : i32
    %119 = tpu.dynamic_rotate %113 by %c63_i32_40 dim 0 : vector<64x128xf32>, i32 -> vector<64x128xf32>
    %cst_41 = arith.constant 0.000000e+00 : f32
    %120 = vector.broadcast %cst_41 : f32 to vector<64x128xf32>
    %121 = arith.select %22, %119, %120 : vector<64x128xi1>, vector<64x128xf32>
    %122 = arith.truncf %118 : vector<64x128xf32> to vector<64x128xbf16>
    %123 = arith.truncf %113 : vector<64x128xf32> to vector<64x128xbf16>
    %124 = arith.truncf %121 : vector<64x128xf32> to vector<64x128xbf16>
    %125 = tpu.concatenate %122, %123, %124 in 1 : vector<64x128xbf16>, vector<64x128xbf16>, vector<64x128xbf16> -> vector<64x384xbf16>
    %cst_42 = arith.constant dense<0.000000e+00> : vector<64x128xf32>
    %126 = tpu.matmul %125, %115, %cst_42 {dimension_numbers = #tpu.dot_dimension_numbers<[1], [0], [0], [1], [0, 0, 1, 1], [], []>} : vector<64x384xbf16>, vector<384x128xbf16>, vector<64x128xf32> -> vector<64x128xf32>
    %127 = vector.shape_cast %126 : vector<64x128xf32> to vector<4x16x128xf32>
    %cst_43 = arith.constant dense<0.000000e+00> : vector<4x128xf32>
    %128 = vector.multi_reduction <add>, %127, %cst_43 [1] : vector<4x16x128xf32> to vector<4x128xf32>
    %129 = arith.mulf %127, %127 : vector<4x16x128xf32>
    %cst_44 = arith.constant dense<0.000000e+00> : vector<4x128xf32>
    %130 = vector.multi_reduction <add>, %129, %cst_44 [1] : vector<4x16x128xf32> to vector<4x128xf32>
    %131 = tpu.concatenate %128, %130 in 0 : vector<4x128xf32>, vector<4x128xf32> -> vector<8x128xf32>
    %c8_i32_45 = arith.constant 8 : i32
    %132 = tpu.dynamic_rotate %131 by %c8_i32_45 dim 1 : vector<8x128xf32>, i32 -> vector<8x128xf32>
    %133 = arith.addf %131, %132 : vector<8x128xf32>
    %c16_i32_46 = arith.constant 16 : i32
    %134 = tpu.dynamic_rotate %133 by %c16_i32_46 dim 1 : vector<8x128xf32>, i32 -> vector<8x128xf32>
    %135 = arith.addf %133, %134 : vector<8x128xf32>
    %c32_i32_47 = arith.constant 32 : i32
    %136 = tpu.dynamic_rotate %135 by %c32_i32_47 dim 1 : vector<8x128xf32>, i32 -> vector<8x128xf32>
    %137 = arith.addf %135, %136 : vector<8x128xf32>
    %c64_i32_48 = arith.constant 64 : i32
    %138 = tpu.dynamic_rotate %137 by %c64_i32_48 dim 1 : vector<8x128xf32>, i32 -> vector<8x128xf32>
    %139 = arith.addf %137, %138 : vector<8x128xf32>
    %140 = vector.extract_strided_slice %139 {offsets = [0, 0], sizes = [4, 128], strides = [1, 1]} : vector<8x128xf32> to vector<4x128xf32>
    %cst_49 = arith.constant 3.906250e-03 : f32
    %141 = vector.broadcast %cst_49 : f32 to vector<4x128xf32>
    %142 = arith.mulf %140, %141 : vector<4x128xf32>
    %143 = vector.extract_strided_slice %139 {offsets = [4, 0], sizes = [4, 128], strides = [1, 1]} : vector<8x128xf32> to vector<4x128xf32>
    %cst_50 = arith.constant 3.906250e-03 : f32
    %144 = vector.broadcast %cst_50 : f32 to vector<4x128xf32>
    %145 = arith.mulf %143, %144 : vector<4x128xf32>
    %146 = arith.mulf %142, %142 : vector<4x128xf32>
    %147 = arith.subf %145, %146 : vector<4x128xf32>
    %cst_51 = arith.constant 9.99999974E-6 : f32
    %148 = vector.broadcast %cst_51 : f32 to vector<4x128xf32>
    %149 = arith.addf %147, %148 : vector<4x128xf32>
    %150 = math.rsqrt %149 : vector<4x128xf32>
    %151 = vector.shape_cast %142 : vector<4x128xf32> to vector<4x1x128xf32>
    %152 = vector.broadcast %151 : vector<4x1x128xf32> to vector<4x16x128xf32>
    %153 = arith.subf %127, %152 : vector<4x16x128xf32>
    %154 = vector.shape_cast %150 : vector<4x128xf32> to vector<4x1x128xf32>
    %155 = vector.broadcast %154 : vector<4x1x128xf32> to vector<4x16x128xf32>
    %156 = arith.mulf %153, %155 : vector<4x16x128xf32>
    %157 = vector.shape_cast %156 : vector<4x16x128xf32> to vector<64x128xf32>
    %cst_52 = arith.constant 0.000000e+00 : f32
    %158 = vector.broadcast %cst_52 : f32 to vector<64x128xf32>
    %159 = arith.maximumf %157, %158 : vector<64x128xf32>
    %c1_53 = arith.constant 1 : index
    %c0_54 = arith.constant 0 : index
    %c0_55 = arith.constant 0 : index
    %160 = vector.load %arg3[%c1_53, %c0_54, %c0_55] : memref<2x384x128xbf16, #tpu.memory_space<vmem>>, vector<1x384x128xbf16>
    %161 = vector.shape_cast %160 : vector<1x384x128xbf16> to vector<384x128xbf16>
    %c1_i32_56 = arith.constant 1 : i32
    %162 = tpu.dynamic_rotate %159 by %c1_i32_56 dim 0 : vector<64x128xf32>, i32 -> vector<64x128xf32>
    %cst_57 = arith.constant 0.000000e+00 : f32
    %163 = vector.broadcast %cst_57 : f32 to vector<64x128xf32>
    %164 = arith.select %20, %162, %163 : vector<64x128xi1>, vector<64x128xf32>
    %c63_i32_58 = arith.constant 63 : i32
    %165 = tpu.dynamic_rotate %159 by %c63_i32_58 dim 0 : vector<64x128xf32>, i32 -> vector<64x128xf32>
    %cst_59 = arith.constant 0.000000e+00 : f32
    %166 = vector.broadcast %cst_59 : f32 to vector<64x128xf32>
    %167 = arith.select %22, %165, %166 : vector<64x128xi1>, vector<64x128xf32>
    %168 = arith.truncf %164 : vector<64x128xf32> to vector<64x128xbf16>
    %169 = arith.truncf %159 : vector<64x128xf32> to vector<64x128xbf16>
    %170 = arith.truncf %167 : vector<64x128xf32> to vector<64x128xbf16>
    %171 = tpu.concatenate %168, %169, %170 in 1 : vector<64x128xbf16>, vector<64x128xbf16>, vector<64x128xbf16> -> vector<64x384xbf16>
    %cst_60 = arith.constant dense<0.000000e+00> : vector<64x128xf32>
    %172 = tpu.matmul %171, %161, %cst_60 {dimension_numbers = #tpu.dot_dimension_numbers<[1], [0], [0], [1], [0, 0, 1, 1], [], []>} : vector<64x384xbf16>, vector<384x128xbf16>, vector<64x128xf32> -> vector<64x128xf32>
    %173 = vector.shape_cast %172 : vector<64x128xf32> to vector<4x16x128xf32>
    %cst_61 = arith.constant dense<0.000000e+00> : vector<4x128xf32>
    %174 = vector.multi_reduction <add>, %173, %cst_61 [1] : vector<4x16x128xf32> to vector<4x128xf32>
    %175 = arith.mulf %173, %173 : vector<4x16x128xf32>
    %cst_62 = arith.constant dense<0.000000e+00> : vector<4x128xf32>
    %176 = vector.multi_reduction <add>, %175, %cst_62 [1] : vector<4x16x128xf32> to vector<4x128xf32>
    %177 = tpu.concatenate %174, %176 in 0 : vector<4x128xf32>, vector<4x128xf32> -> vector<8x128xf32>
    %c8_i32_63 = arith.constant 8 : i32
    %178 = tpu.dynamic_rotate %177 by %c8_i32_63 dim 1 : vector<8x128xf32>, i32 -> vector<8x128xf32>
    %179 = arith.addf %177, %178 : vector<8x128xf32>
    %c16_i32_64 = arith.constant 16 : i32
    %180 = tpu.dynamic_rotate %179 by %c16_i32_64 dim 1 : vector<8x128xf32>, i32 -> vector<8x128xf32>
    %181 = arith.addf %179, %180 : vector<8x128xf32>
    %c32_i32_65 = arith.constant 32 : i32
    %182 = tpu.dynamic_rotate %181 by %c32_i32_65 dim 1 : vector<8x128xf32>, i32 -> vector<8x128xf32>
    %183 = arith.addf %181, %182 : vector<8x128xf32>
    %c64_i32_66 = arith.constant 64 : i32
    %184 = tpu.dynamic_rotate %183 by %c64_i32_66 dim 1 : vector<8x128xf32>, i32 -> vector<8x128xf32>
    %185 = arith.addf %183, %184 : vector<8x128xf32>
    %186 = vector.extract_strided_slice %185 {offsets = [0, 0], sizes = [4, 128], strides = [1, 1]} : vector<8x128xf32> to vector<4x128xf32>
    %cst_67 = arith.constant 3.906250e-03 : f32
    %187 = vector.broadcast %cst_67 : f32 to vector<4x128xf32>
    %188 = arith.mulf %186, %187 : vector<4x128xf32>
    %189 = vector.extract_strided_slice %185 {offsets = [4, 0], sizes = [4, 128], strides = [1, 1]} : vector<8x128xf32> to vector<4x128xf32>
    %cst_68 = arith.constant 3.906250e-03 : f32
    %190 = vector.broadcast %cst_68 : f32 to vector<4x128xf32>
    %191 = arith.mulf %189, %190 : vector<4x128xf32>
    %192 = arith.mulf %188, %188 : vector<4x128xf32>
    %193 = arith.subf %191, %192 : vector<4x128xf32>
    %cst_69 = arith.constant 9.99999974E-6 : f32
    %194 = vector.broadcast %cst_69 : f32 to vector<4x128xf32>
    %195 = arith.addf %193, %194 : vector<4x128xf32>
    %196 = math.rsqrt %195 : vector<4x128xf32>
    %197 = vector.shape_cast %188 : vector<4x128xf32> to vector<4x1x128xf32>
    %198 = vector.broadcast %197 : vector<4x1x128xf32> to vector<4x16x128xf32>
    %199 = arith.subf %173, %198 : vector<4x16x128xf32>
    %200 = vector.shape_cast %196 : vector<4x128xf32> to vector<4x1x128xf32>
    %201 = vector.broadcast %200 : vector<4x1x128xf32> to vector<4x16x128xf32>
    %202 = arith.mulf %199, %201 : vector<4x16x128xf32>
    %203 = vector.shape_cast %202 : vector<4x16x128xf32> to vector<64x128xf32>
    %204 = arith.addf %113, %203 : vector<64x128xf32>
    %205 = vector.shape_cast %204 : vector<64x128xf32> to vector<4x16x128xf32>
    %c0_70 = arith.constant 0 : index
    %c0_71 = arith.constant 0 : index
    %c0_72 = arith.constant 0 : index
    %206 = vector.load %arg4[%c0_70, %c0_71, %c0_72] : memref<4x16x128xf32, #tpu.memory_space<vmem>>, vector<4x16x128xf32>
    tpu.vector_store %arg4[%c0_70, %c0_71, %c0_72], %205 {strides = array<i32>} : memref<4x16x128xf32, #tpu.memory_space<vmem>>, vector<4x16x128xf32>,
    return
  }
  func.func @transform_0(%arg0: i32) -> (i32, i32, i32) {
    %c0_i32 = arith.constant 0 : i32
    %c0_i32_0 = arith.constant 0 : i32
    %c0_i32_1 = arith.constant 0 : i32
    return %arg0, %c0_i32, %c0_i32_0 : i32, i32, i32
  }
  func.func @transform_1(%arg0: i32) -> (i32, i32, i32) {
    %c0_i32 = arith.constant 0 : i32
    %c0_i32_0 = arith.constant 0 : i32
    %c0_i32_1 = arith.constant 0 : i32
    %c0_i32_2 = arith.constant 0 : i32
    return %c0_i32, %c0_i32_0, %c0_i32_1 : i32, i32, i32
  }
  func.func @transform_2(%arg0: i32) -> (i32, i32, i32) {
    %c0_i32 = arith.constant 0 : i32
    %c0_i32_0 = arith.constant 0 : i32
    %c0_i32_1 = arith.constant 0 : i32
    %c0_i32_2 = arith.constant 0 : i32
    return %c0_i32, %c0_i32_0, %c0_i32_1 : i32, i32, i32
  }
  func.func @transform_3(%arg0: i32) -> (i32, i32, i32) {
    %c0_i32 = arith.constant 0 : i32
    %c0_i32_0 = arith.constant 0 : i32
    %c0_i32_1 = arith.constant 0 : i32
    return %arg0, %c0_i32, %c0_i32_0 : i32, i32, i32
  }
}

</mosaic_0001>

<bundles_post_ra>
// kernel: tpu_custom_call.1
= control target key start
LH: loop header
LB: loop body
LE: loop exit
PB: predicated region body
PF: predicated region fallthrough
CT: control target
= control target key end

     0   :  { %8 = vsyncpa [#allocation3], 0  ;;  %s4645_s0 = inlined_call_operand.hbm [shape: f32[8,16,128], index: 0, kind: input, shape index: {}]   ;;  %s4646_s1 = inlined_call_operand.hbm [shape: bf16[2,384,128], index: 1, kind: input, shape index: {}]   ;;  %s4647_s2 = inlined_call_operand.hbm [shape: bf16[2,384,128], index: 2, kind: input, shape index: {}]   ;;  %s4648_s3 = inlined_call_operand.hbm [shape: f32[8,16,128], index: 3, kind: output, shape index: {}]  }
   0x1   :  { %10 = vsyncpa [#allocation3 + $0x1], 0 }
   0x2   :  { %11 = vsyncpa [#allocation6], 0 }
   0x3   :  { %12 = vsyncpa [#allocation4], 0 }
   0x4   :  { %14 = vsyncpa [#allocation4 + $0x1], 0  ;;  %s3764_s12 = smov 0   ;;  %s3766_s13 = smov 0  }
   0x5   :  { %s3768_s14 = smov 0   ;;  %s3770_s15 = smov 0  }
   0x6 LB: > { %s3785_s16 = sadd.s32 4294967295, %s3727_s15   ;;  %s2869_s17 = sadd.s32 4294967294, %s3727_s15   ;;  %s3727_s15 = sphi %s3770_s15, %s4744_s15   ;;  %s3723_s14 = sphi %s3768_s14, %s4743_s14   ;;  %s3719_s13 = sphi %s3766_s13, %s4742_s13   ;;  %s3715_s12 = sphi %s3764_s12, %s4741_s12  }
   0x7   : > { %p40_p0 = scmp.ne.s32.totalorder %s3719_s13, %s3715_s12  ;;  %p4649_p1 = scmp.eq.s32.totalorder %s3785_s16, 0 }
   0x8   : > { %p112_p3 = scmp.eq.s32.totalorder %s2869_s17, 1  ;;  %p2870_p5 = scmp.ge.s32.totalorder %s3727_s15, 1 }
   0x9   : > { %p3794_p4 = por %p4649_p1, %p40_p0  ;;  %p119_p7 = scmp.lt.s32.totalorder %s3727_s15, 3 }
   0xa   : > { %p3799_p6 = por %p112_p3, %p40_p0  ;;  %s3729_s21 = smov [#allocation5]  }
   0xb   : > { %s4659_s18 = scalar_select %p3794_p4, 1, 0 }
   0xc   : > { %s4660_s19 = scalar_select %p3799_p6, 1, 0 }
   0xd   : > { %p3804_p8 = pnand %p2870_p5, %p119_p7  ;;  %s131_s22 = sshll.u32 %s3729_s21, 4  ;;  %s132_s22 = int_to_ptr.vmem [resolvable:$true] %s131_s22 }
   0xe   : > { %s3730_s24 = smov [#allocation7]   ;;  %s3590_s26 = scalar_lea.vmem %s132_s22, 6144 }
   0xf   : > { %s4661_s20 = scalar_select %p3804_p8, 1, 0 }
  0x10   : > { %p3401_p9 = pneg %p3804_p8  ;;  %s144_s25 = sshll.u32 %s3730_s24, 4  ;;  %s145_s25 = int_to_ptr.vmem [resolvable:$true] %s144_s25 }
  0x11   : > { %p3591_p13 = scmp.ne.s32.totalorder %s132_s22, %s3590_s26  ;;  %p3598_p5 = scmp.lt.s32.totalorder %s132_s22, %s132_s22 }
  0x12   : > { %p3813_p11 = pnand %p3401_p9, %p4649_p1  ;;  %p3599_p7 = scmp.lt.s32.totalorder %s3590_s26, %s3590_s26 }
  0x14   : > { %p3581_p12 = pneg %p3813_p11  ;;  %p3600_p10 = por %p3599_p7, %p3598_p5 }
  0x16   : > { %p3593_p0 = pnand %p3591_p13, %p3581_p12 }
  0x18   : > { %p3594_p3 = pneg %p3593_p0 }
  0x1a   : > { %p3601_p9 = pnand %p3600_p10, %p3594_p3 }
  0x1c   : > { %3604 = shalt.err (!%p3601_p9)
}
  0x1d   : > { %s3731_s27 = smov 64   ;;  %s3732_s28 = smov 4  }
  0x1e   : > { %3404 = dma.hbm_to_vmem [thread:$0]  (!%p3813_p11), %s4646_s1, 6144, %s132_s22, [#allocation6], %s3731_s27, %s3731_s27, %s3732_s28  }
  0x1f   : > { %s3616_s4 = scalar_lea.vmem %s145_s25, 6144  ;;  %p3624_p2 = scmp.lt.s32.totalorder %s145_s25, %s145_s25 }
  0x20   : > { %p3617_p1 = scmp.ne.s32.totalorder %s145_s25, %s3616_s4  ;;  %p3625_p6 = scmp.lt.s32.totalorder %s3616_s4, %s3616_s4 }
  0x22   : > { %p3619_p13 = pnand %p3617_p1, %p3581_p12  ;;  %p3626_p5 = por %p3625_p6, %p3624_p2 }
  0x24   : > { %p3620_p0 = pneg %p3619_p13 }
  0x26   : > { %p3627_p10 = pnand %p3626_p5, %p3620_p0 }
  0x28   : > { %3630 = shalt.err (!%p3627_p10)
}
  0x29   : > { %3407 = dma.hbm_to_vmem [thread:$0]  (!%p3813_p11), %s4647_s2, 6144, %s145_s25, [#allocation6], %s3731_s27, %s3731_s27, %s3732_s28  }
  0x2a   : > { %s3836_s7 = sadd.s32 1, %s3727_s15   ;;  %s27_s8 = sadd.s32 1, %s3723_s14 }
  0x2b   : > { %s24_s9 = ssub.s32 %s3727_s15, %s3836_s7  ;;  %p34_p1 = scmp.ne.s32.totalorder %s3723_s14, %s3719_s13 }
  0x2c   : > { %p25_p2 = scmp.eq.s32.totalorder %s24_s9, 0  ;;  %p35_p6 = scmp.eq.s32.totalorder %s3727_s15, 0 }
  0x2d   : > { %p4663_p12 = scmp.eq.s32.totalorder %s3785_s16, 1  ;;  %p3418_p7 = scmp.lt.s32.totalorder %s3727_s15, 2 }
  0x2e   : > { %s3852_s11 = scalar_select %p25_p2, %s3723_s14, %s27_s8  }
  0x2f   : > { %p3846_p3 = por %p4663_p12, %p34_p1  ;;  %p36_p9 = por %p35_p6, %p34_p1 }
  0x30   : > { %s158_s17 = sand.u32 1, %s3723_s14   ;;  %s3082_s22 = sshll.u32 %s3727_s15, 10 }
  0x31   : > { %s4664_s10 = scalar_select %p3846_p3, 1, 0 }
  0x32   : > { %s2874_s21 = sshll.u32 %s158_s17, 6  ;;  %s3859_s25 = scalar_lea.hbm %s4645_s0, %s3082_s22 }
  0x33   : > { %s162_s26 = scalar_lea.vmem [#allocation2], %s2874_s21  ;;  %p3863_p11 = pnand %p3418_p7, %p36_p9 }
  0x34   : > { %s170_s27 = sshll.u32 %s162_s26, 4  ;;  %s3867_s29 = scalar_lea.sflag [#allocation3], %s158_s17  ;;  %s3861_s27 = int_to_ptr.vmem [resolvable:$true] %s170_s27 }
  0x35   : > { %s3631_s30 = scalar_lea.hbm %s3859_s25, 1024  ;;  %p3633_p0 = pneg %p3863_p11 }
  0x36   : > { %p3632_p13 = scmp.ne.s32.totalorder %s3859_s25, %s3631_s30  ;;  %s3636_s6 = scalar_lea.hbm %s4645_s0, 2048 }
  0x37   : > { %p3637_p1 = scmp.lt.s32.totalorder %s3859_s25, %s4645_s0  ;;  %p3638_p2 = scmp.lt.s32.totalorder %s3636_s6, %s3631_s30 }
  0x38   : > { %p3634_p5 = pnand %p3633_p0, %p3632_p13 }
  0x39   : > { %p3639_p6 = por %p3638_p2, %p3637_p1 }
  0x3a   : > { %p3635_p10 = pneg %p3634_p5 }
  0x3c   : > { %p3640_p12 = pnand %p3639_p6, %p3635_p10 }
  0x3e   : > { %3643 = shalt.err (!%p3640_p12)
}
  0x3f   : > { %s3644_s17 = scalar_lea.vmem %s3861_s27, 1024  ;;  %s3733_s21 = smov [#allocation2]  }
  0x40   : > { %p3645_p7 = scmp.ne.s32.totalorder %s3861_s27, %s3644_s17  ;;  %s3649_s22 = sshll.u32 %s3733_s21, 4  ;;  %s3650_s22 = int_to_ptr.vmem [resolvable:$false] %s3649_s22 }
  0x41   : > { %s3651_s23 = scalar_lea.vmem %s3650_s22, 2048  ;;  %p3652_p5 = scmp.lt.s32.totalorder %s3861_s27, %s3650_s22 }
  0x42   : > { %p3647_p9 = pnand %p3645_p7, %p3633_p0  ;;  %p3653_p3 = scmp.lt.s32.totalorder %s3651_s23, %s3644_s17 }
  0x44   : > { %p3648_p13 = pneg %p3647_p9  ;;  %p3654_p4 = por %p3653_p3, %p3652_p5 }
  0x46   : > { %p3655_p8 = pnand %p3654_p4, %p3648_p13 }
  0x48   : > { %3658 = shalt.err (!%p3655_p8)
}
  0x49   : > { %s3734_s24 = smov 128   ;;  %s3735_s26 = smov 8  }
  0x4a   : > { %3411 = dma.hbm_to_vmem [thread:$0]  (!%p3863_p11), %s3859_s25, 1024, %s3861_s27, %s3867_s29, %s3734_s24, %s3734_s24, %s3735_s26  }
  0x4b   : > { %p4666_p0 = scmp.ne.s32.totalorder %s4661_s20, 0 }
  0x4c   : > { %s3891_s30 = sand.u32 (!%p4666_p0), 1, %s3719_s13   ;;  %p4667_p4 = scmp.ne.s32.totalorder (!%p4666_p0), %s4659_s18, 0 }
  0x4d   : > { %182 = sbr.rel (%p4666_p0) target bundleno = 3160 (0xc58), region = 32  ;;  %s2879_s4 = sshll.u32 (!%p4666_p0), %s3891_s30, 6 }
  0x4e   : > { %s185_s5 = scalar_lea.sflag (!%p4666_p0), [#allocation3], %s3891_s30  ;;  %s3897_s6 = scalar_lea.vmem (!%p4666_p0), [#allocation2], %s2879_s4 }
  0x52   : > { %3702 = dma.done.wait (%p4667_p4), %s185_s5, 1024  }
  0x53   : > { %3704 = vsyncadd (%p4667_p4), %s185_s5, 4294966272  ;;  %p4668_p8 = scmp.eq.s32.totalorder %s3785_s16, 0 }
  0x55   : > { %3706 = dma.done.wait (%p4668_p8), [#allocation6], 12288   ;;  %p4669_p3 = pmov %p4668_p8 }
  0x56   : > { %v3467_v0 = vld [vmem:[#allocation5 + $0x78] sm:$0xff]   ;;  %v3470_v3 = vld [vmem:[#allocation5 + $0x70] sm:$0xff]   ;;  %v230_v4 = vlaneseq  ;;  %v3473_v7 = vld [vmem:[#allocation5 + $0x68] sm:$0xff]   ;;  %vm3736_vm6 = vmmov 1   ;;  %s3737_s18 = smov 8   ;;  %s3738_s20 = smov 16  }
  0x57   : > { %3708 = vsyncadd (%p4669_p3), [#allocation6], 4294955008  ;;  %v3468_v1 = vld [vmem:[#allocation5 + $0x38] sm:$0xff]   ;;  %3085 = vmatprep.subr.bf16.mxu0 %v3467_v0  ;;  %v3471_v5 = vld [vmem:[#allocation5 + $0x30] sm:$0xff]   ;;  %s3739_s25 = smov 32   ;;  %s3740_s27 = smov 64  }
  0x58   : > { %v3469_v2 = vld [vmem:[#allocation5 + $0xb8] sm:$0xff]   ;;  %3086 = vmatpush3.bf16.msra.mxu0 %v3468_v1  ;;  %v3472_v6 = vld [vmem:[#allocation5 + $0xb0] sm:$0xff]   ;;  %v3474_v8 = vld [vmem:[#allocation5 + $0x28] sm:$0xff]   ;;  %v3907_v9 = vshrl.u32 %v230_v4, 7  ;;  %s3084_s28 = sshll.u32 %s3785_s16, 10  ;;  %s218_s29 = scalar_lea.vmem [#allocation8], %s2879_s4 }
  0x59   : > { %3293 = vmatprep.subr.bf16.mxu1 %v3469_v2  ;;  %3087 = vmatprep.subr.bf16.mxu0 %v3470_v3  ;;  %v3475_v10 = vld [vmem:[#allocation5 + $0xa8] sm:$0xff]   ;;  %v3476_v11 = vld [vmem:[#allocation5 + $0x60] sm:$0xff]   ;;  %v3479_v15 = vld [vmem:[#allocation5 + $0x58] sm:$0xff]   ;;  %s2777_s8 = sshll.u32 %s218_s29, 4  ;;  %s4597_s17 = scalar_lea.hbm %s4648_s3, %s3084_s28  ;;  %s4601_s8 = int_to_ptr.vmem [resolvable:$true] %s2777_s8 }
  0x5a   : > { %3294 = vmatpush3.bf16.msra.mxu1 %v3469_v2  ;;  %v3477_v12 = vld [vmem:[#allocation5 + $0x20] sm:$0xff]   ;;  %v232_v14 = vadd.s32 8, %v3907_v9  ;;  %v243_v16 = vand.u32 15, %v3907_v9  ;;  %v234_v17 = vadd.s32 24, %v3907_v9  ;;  %v3481_v18 = vld [vmem:[#allocation5 + $0x98] sm:$0xff]   ;;  %v233_v19 = vadd.s32 16, %v3907_v9 }
  0x5b   : > { %3295 = vmatprep.subr.bf16.mxu1 %v3472_v6  ;;  %v3478_v13 = vld [vmem:[#allocation5 + $0xa0] sm:$0xff]   ;;  %v3480_v20 = vld [vmem:[#allocation5 + $0x18] sm:$0xff]   ;;  %v3482_v22 = vld [vmem:[#allocation5 + $0x50] sm:$0xff]   ;;  %vm407_vm0 = vcmp.lt.s32.totalorder %v3907_v9, 1  ;;  %v235_v23 = vadd.s32 32, %v3907_v9  ;;  %vm4653_vm1 = vcmp.lt.s32.totalorder %v3907_v9, 7 }
  0x5c   : > { %3088 = vmatpush3.bf16.msra.mxu0 %v3471_v5  ;;  %v250_v21 = vand.u32 15, %v232_v14  ;;  %v264_v24 = vand.u32 15, %v234_v17  ;;  %v236_v25 = vadd.s32 40, %v3907_v9  ;;  %v3484_v26 = vld [vmem:[#allocation5 + $0x90] sm:$0xff]   ;;  %vm3917_vm2 = vcmp.ge.s32.totalorder %v243_v16, 1  ;;  %v3485_v31 = vld [vmem:[#allocation5 + $0x48] sm:$0xff]  }
  0x5d   : > { %3089 = vmatprep.subr.bf16.mxu0 %v3473_v7  ;;  %v238_v28 = vadd.s32 56, %v3907_v9  ;;  %v3483_v29 = vld [vmem:[#allocation5 + $0x10] sm:$0xff]   ;;  %v257_v32 = vand.u32 15, %v233_v19  ;;  %v3486_v33 = vld [vmem:[#allocation5 + $0x8] sm:$0xff]   ;;  %v271_v36 = vand.u32 15, %v235_v23  ;;  %v3488_v37 = vld [vmem:[#allocation5 + $0x40] sm:$0xff]  }
  0x5e   : > { %3296 = vmatpush3.bf16.msra.mxu1 %v3472_v6  ;;  %vm3922_vm3 = vcmp.le.s32.totalorder %v250_v21, 14  ;;  %vm3926_vm4 = vcmp.le.s32.totalorder %v264_v24, 14  ;;  %v3487_v35 = vld [vmem:[#allocation5 + $0x88] sm:$0xff]   ;;  %v278_v38 = vand.u32 15, %v236_v25  ;;  %v3931_v39 = vld [vmem:[%s3897_s6] sm:$0xff]  ;;  %v3937_v41 = vld [vmem:[%s3897_s6 + $0x38] sm:$0xff] }
  0x5f   : > { %3297 = vmatprep.subr.bf16.mxu1 %v3475_v10  ;;  %v3934_v40 = vld [vmem:[%s3897_s6 + $0x8] sm:$0xff]  ;;  %vm3939_vm5 = vcmp.ge.s32.totalorder %v257_v32, 1  ;;  %v292_v43 = vand.u32 15, %v238_v28  ;;  %v3944_v44 = vadd.s32 48, %v3907_v9  ;;  %v3489_v45 = vld [vmem:[#allocation5] sm:$0xff]   ;;  %v399_v46 = vrot.slane %v3931_v39, 7  ;;  %vm3970_vm7 = vmpackc.low %vm3922_vm3, %vm3736_vm6 }
  0x60   : > { %3090 = vmatpush3.bf16.msra.mxu0 %v3474_v8  ;;  %v400_v47 = vrot.slane %v3934_v40, 7  ;;  %v453_v48 = vpack.c.bf16 %v3934_v40, %v3931_v39  ;;  %v406_v49 = vrot.slane %v3937_v41, 7  ;;  %v224_v50 = vld [vmem:[%s3897_s6 + $0x10] sm:$0xff]  ;;  %v3953_v51 = vld [vmem:[%s3897_s6 + $0x18] sm:$0xff]  ;;  %v3490_v52 = vld [vmem:[#allocation5 + $0x80] sm:$0xff]   ;;  %v424_v53 = vrot.slane %v3931_v39, 1 }
  0x61   : > { %3091 = vmatprep.subr.bf16.mxu0 %v3476_v11  ;;  %v425_v54 = vrot.slane %v3934_v40, 1  ;;  %v426_v55 = vrot.slane %v224_v50, 1  ;;  %v3958_v56 = vld [vmem:[%s3897_s6 + $0x20] sm:$0xff]  ;;  %v427_v57 = vrot.slane %v3953_v51, 1  ;;  %v227_v62 = vld [vmem:[%s3897_s6 + $0x28] sm:$0xff]  ;;  %vm3976_vm8 = vcmp.le.s32.totalorder %v278_v38, 14  ;;  %vm3996_vm11 = vmpackc.low %vm3736_vm6, %vm3917_vm2 }
  0x62   : > { %3298 = vmatpush3.bf16.msra.mxu1 %v3475_v10  ;;  %637 = vmatprep.mubr.bf16.mxu0 %v453_v48  ;;  %v414_v58 = vsel %vm407_vm0, %v399_v46, %v400_v47  ;;  %v415_v59 = vsel %vm407_vm0, %v406_v49, %v399_v46  ;;  %v428_v61 = vrot.slane %v3958_v56, 1  ;;  %vm3984_vm9 = vcmp.ge.s32.totalorder %v271_v36, 1  ;;  %v228_v3 = vld [vmem:[%s3897_s6 + $0x30] sm:$0xff]  ;;  %vm4008_vm12 = vmpackc.low %vm3926_vm4, %vm3736_vm6  ;;  %s2763_s21 = scalar_lea.sflag [#allocation4], %s3891_s30  ;;  %s3659_s22 = scalar_lea.vmem %s4601_s8, 1024 }
  0x63   : > { %3299 = vmatprep.subr.bf16.mxu1 %v3478_v13  ;;  %v438_v0 = vsel %vm4653_vm1, %v425_v54, %v426_v55  ;;  %v439_v1 = vsel %vm4653_vm1, %v424_v53, %v425_v54  ;;  %vm3989_vm10 = vcmp.le.s32.totalorder %v292_v43, 14  ;;  %v437_v8 = vsel %vm4653_vm1, %v426_v55, %v427_v57  ;;  %vm4019_vm13 = vmpackc.low %vm3736_vm6, %vm3939_vm5  ;;  %p3660_p11 = scmp.ne.s32.totalorder %s4601_s8, %s3659_s22  ;;  %p4738_p10 = scmp.ne.s32.totalorder %s4664_s10, 0 }
  0x64   : > { %3092 = vmatpush3.bf16.msra.mxu0 %v3477_v12  ;;  %v2920_v6 = vpack.c.bf16 %v438_v0, %v439_v1  ;;  %v436_v7 = vsel %vm4653_vm1, %v427_v57, %v428_v61  ;;  %v285_v10 = vand.u32 15, %v3944_v44  ;;  %v2908_v11 = vpack.c.bf16 %v414_v58, %v415_v59  ;;  %vm4029_vm14 = vmpackc.low %vm3976_vm8, %vm3736_vm6  ;;  %s3742_s23 = smov [#allocation8]  }
  0x65   : > { %3093 = vmatprep.subr.bf16.mxu0 %v3479_v15  ;;  %v429_v14 = vrot.slane %v227_v62, 1  ;;  %v454_v15 = vpack.c.bf16 %v3953_v51, %v224_v50  ;;  %v402_v16 = vrot.slane %v3953_v51, 7  ;;  %v2923_v19 = vpack.c.bf16 %v436_v7, %v437_v8  ;;  %vm4039_vm15 = vmpackc.low %vm3989_vm10, %vm3736_vm6  ;;  %p3661_p1 = pnand %p3660_p11, %p4738_p10  ;;  %s3663_s24 = sshll.u32 %s3742_s23, 4  ;;  %s3664_s24 = int_to_ptr.vmem [resolvable:$false] %s3663_s24 }
  0x66   : > { %3300 = vmatpush3.bf16.msra.mxu1 %v3478_v13  ;;  %v401_v13 = vrot.slane %v224_v50, 7  ;;  %3309 = vmatprep.mubr.msk.bf16.mxu1 %vm3970_vm7, %v2920_v6  ;;  %v403_v21 = vrot.slane %v3958_v56, 7  ;;  %v431_v25 = vrot.slane %v3937_v41, 1  ;;  %v405_v27 = vrot.slane %v228_v3, 7  ;;  %vm4065_vm3 = vmpackc.low %vm3736_vm6, %vm3984_vm9  ;;  %s3665_s26 = scalar_lea.vmem %s3664_s24, 2048  ;;  %p3666_p6 = scmp.lt.s32.totalorder %s4601_s8, %s3664_s24 }
  0x67   : > { %3301 = vmatprep.subr.bf16.mxu1 %v3481_v18  ;;  %vm4051_vm2 = vcmp.ge.s32.totalorder %v285_v10, 1  ;;  %v456_v42 = vpack.c.bf16 %v3937_v41, %v228_v3  ;;  %vm803_vm5 = vcmask 1041409   ;;  %vm4658_vm8 = vcmask 1042434   ;;  %p3662_p2 = pneg %p3661_p1  ;;  %p3667_p12 = scmp.lt.s32.totalorder %s3665_s26, %s3659_s22 }
  0x68   : > { %3094 = vmatpush3.bf16.msra.mxu0 %v3480_v20  ;;  %v404_v20 = vrot.slane %v227_v62, 7  ;;  %v413_v30 = vsel %vm407_vm0, %v400_v47, %v401_v13  ;;  %v411_v39 = vsel %vm407_vm0, %v402_v16, %v403_v21  ;;  %vm4081_vm4 = vmpackc.low %vm3736_vm6, %vm4051_vm2  ;;  %v408_v44 = vsel %vm407_vm0, %v405_v27, %v406_v49 }
  0x69   : > { %3095 = vmatprep.subr.bf16.mxu0 %v3482_v22  ;;  %v435_v22 = vsel %vm4653_vm1, %v428_v61, %v429_v14  ;;  %vm814_vm6 = vcmask 1045509   ;;  %vm4657_vm9 = vcmask 1046534   ;;  %vm4656_vm10 = vcmask 1043459   ;;  %p3668_p7 = por %p3667_p12, %p3666_p6 }
  0x6a   : > { %3302 = vmatpush3.bf16.msra.mxu1 %v3481_v18  ;;  %v430_v18 = vrot.slane %v228_v3, 1  ;;  %v410_v38 = vsel %vm407_vm0, %v403_v21, %v404_v20  ;;  %vm4655_vm2 = vcmask 1047559  }
  0x6b   : > { %3303 = vmatprep.subr.bf16.mxu1 %v3484_v26  ;;  %v2914_v40 = vpack.c.bf16 %v410_v38, %v411_v39  ;;  %p3669_p9 = pnand %p3668_p7, %p3662_p2 }
  0x6c   : > { %3096 = vmatpush3.bf16.msra.mxu0 %v3483_v29  ;;  %v434_v24 = vsel %vm4653_vm1, %v429_v14, %v430_v18  ;;  %v412_v29 = vsel %vm407_vm0, %v401_v13, %v402_v16  ;;  %v433_v32 = vsel %vm4653_vm1, %v430_v18, %v431_v25 }
  0x6d   : > { %3097 = vmatprep.subr.bf16.mxu0 %v3485_v31  ;;  %v2926_v28 = vpack.c.bf16 %v434_v24, %v435_v22  ;;  %v2911_v34 = vpack.c.bf16 %v412_v29, %v413_v30 }
  0x6e   : > { %3304 = vmatpush3.bf16.msra.mxu1 %v3484_v26 }
  0x6f   : > { %3305 = vmatprep.subr.bf16.mxu1 %v3487_v35 }
  0x70   : > { %3098 = vmatpush3.bf16.msra.mxu0 %v3486_v33  ;;  %v440_v33 = vsel %vm4653_vm1, %v431_v25, %v424_v53  ;;  %vm4654_vm1 = vcmask 1043456  }
  0x71   : > { %3099 = vmatprep.subr.bf16.mxu0 %v3488_v37  ;;  %v2929_v37 = vpack.c.bf16 %v440_v33, %v433_v32 }
  0x72   : > { %3306 = vmatpush3.bf16.msra.mxu1 %v3487_v35  ;;  %v455_v35 = vpack.c.bf16 %v227_v62, %v3958_v56 }
  0x73   : > { %3307 = vmatprep.subr.bf16.mxu1 %v3490_v52 }
  0x74   : > { %3100 = vmatpush3.bf16.msra.mxu0 %v3489_v45  ;;  %v409_v45 = vsel %vm407_vm0, %v404_v20, %v405_v27 }
  0x75   : > { %v2917_v46 = vpack.c.bf16 %v408_v44, %v409_v45 }
  0x76   : > { %3308 = vmatpush3.bf16.msra.mxu1 %v3490_v52 }
  0x77   : > { %2909 = vmatmul.mubr.msk.bf16.vlgmr.msra.gmra.mxu0 %vm3996_vm11, %v2908_v11 }
  0x78   : > { %645 = vmatprep.mubr.bf16.mxu0 %v454_v15 }
  0x79   : > { %3310 = vmatmul.mubr.msk.bf16.vlgmr.msra.gmra.mxu1 %vm4008_vm12, %v2923_v19 }
  0x7a   : > { %3313 = vmatprep.mubr.msk.bf16.mxu1 %vm4029_vm14, %v2926_v28 }
  0x7f   : > { %2912 = vmatmul.mubr.msk.bf16.gmra.mxu0 %vm4019_vm13, %v2911_v34 }
  0x80   : > { %653 = vmatprep.mubr.bf16.mxu0 %v455_v35 }
  0x81   : > { %3314 = vmatmul.mubr.msk.bf16.gmra.mxu1 %vm4039_vm15, %v2929_v37 }
  0x87   : > { %2915 = vmatmul.mubr.msk.bf16.gmra.mxu0 %vm4065_vm3, %v2914_v40 }
  0x88   : > { %661 = vmatprep.mubr.bf16.mxu0 %v456_v42 }
  0x8f   : > { %2918 = vmatmul.mubr.msk.bf16.gmra.mxu0 %vm4081_vm4, %v2917_v46 }
 0x137   : > { %v3101_v47 = vpop.f32.mrf.mxu0 }
 0x139   : > { %v3102_v48 = vpop.f32.mrf.mxu0  ;;  %v3311_v50 = vpop.f32.mrf.mxu1 }
 0x13a   : > { %v3103_v61 = vadd.f32 %v3102_v48, %v3101_v47 }
 0x13b   : > { %v3104_v51 = vpop.f32.mrf.mxu0  ;;  %v704_v52 = vpop.f32.mrf.mxu1 }
 0x13c   : > { %v4099_v4 = vadd.f32 %v3103_v61, %v704_v52 }
 0x13d   : > { %v3105_v53 = vpop.f32.mrf.mxu0  ;;  %v3312_v54 = vpop.f32.mrf.mxu1 }
 0x13e   : > { %v3106_v57 = vadd.f32 %v3105_v53, %v3104_v51  ;;  %v763_v16 = vmul.f32 %v4099_v4, %v4099_v4 }
 0x13f   : > { %v3107_v55 = vpop.f32.mrf.mxu0  ;;  %v707_v56 = vpop.f32.mrf.mxu1 }
 0x140   : > { %v4095_v63 = vadd.f32 %v3106_v57, %v707_v56 }
 0x141   : > { %v3108_v41 = vpop.f32.mrf.mxu0  ;;  %v3315_v49 = vpop.f32.mrf.mxu1 }
 0x142   : > { %v3109_v58 = vadd.f32 %v3108_v41, %v3107_v55  ;;  %v764_v8 = vmul.f32 %v4095_v63, %v4095_v63  ;;  %v735_v20 = vadd.f32 %v4095_v63, %v4099_v4 }
 0x143   : > { %v3110_v59 = vpop.f32.mrf.mxu0  ;;  %v720_v2 = vpop.f32.mrf.mxu1 }
 0x144   : > { %v4097_v0 = vadd.f32 %v3311_v50, %v3109_v58  ;;  %v771_v22 = vadd.f32 %v764_v8, %v763_v16  ;;  %v736_v31 = vrot.slane %v735_v20, 4 }
 0x145   : > { %v3111_v62 = vpop.f32.mrf.mxu0  ;;  %v3316_v13 = vpop.f32.mrf.mxu1 }
 0x146   : > { %v3112_v1 = vadd.f32 %v3111_v62, %v3110_v59  ;;  %v765_v10 = vmul.f32 %v4097_v0, %v4097_v0  ;;  %v772_v34 = vrot.slane %v771_v22, 4  ;;  %v737_v45 = vadd.f32 %v736_v31, %v735_v20 }
 0x147   : > { %v3113_v3 = vpop.f32.mrf.mxu0  ;;  %v723_v24 = vpop.f32.mrf.mxu1 }
 0x148   : > { %v4101_v6 = vadd.f32 %v3312_v54, %v3112_v1  ;;  %v773_v50 = vadd.f32 %v772_v34, %v771_v22  ;;  %v738_v57 = vrot.slane %v737_v45, 2 }
 0x149   : > { %v3114_v7 = vpop.f32.mrf.mxu0 }
 0x14a   : > { %v766_v11 = vmul.f32 %v4101_v6, %v4101_v6  ;;  %v3115_v14 = vadd.f32 %v3114_v7, %v3113_v3  ;;  %v742_v18 = vadd.f32 %v4101_v6, %v4097_v0  ;;  %v774_v61 = vrot.slane %v773_v50, 2 }
 0x14b   : > { %v3116_v15 = vpop.f32.mrf.mxu0 }
 0x14c   : > { %v778_v19 = vadd.f32 %v766_v11, %v765_v10  ;;  %v4115_v25 = vadd.f32 %v3115_v14, %v720_v2  ;;  %v743_v29 = vrot.slane %v742_v18, 4  ;;  %v739_v14 = vadd.f32 %v738_v57, %v737_v45 }
 0x14d   : > { %v3117_v21 = vpop.f32.mrf.mxu0 }
 0x14e   : > { %v3118_v27 = vadd.f32 %v3117_v21, %v3116_v15  ;;  %v779_v30 = vrot.slane %v778_v19, 4  ;;  %v767_v37 = vmul.f32 %v4115_v25, %v4115_v25  ;;  %v744_v42 = vadd.f32 %v743_v29, %v742_v18 }
 0x14f   : > { %v3119_v28 = vpop.f32.mrf.mxu0  ;;  %v775_v15 = vadd.f32 %v774_v61, %v773_v50 }
 0x150   : > { %v4117_v32 = vadd.f32 %v3118_v27, %v723_v24  ;;  %v780_v44 = vadd.f32 %v779_v30, %v778_v19  ;;  %v745_v55 = vrot.slane %v744_v42, 2 }
 0x151   : > { %v3120_v33 = vpop.f32.mrf.mxu0  ;;  %v776_v29 = vrot.slane %v775_v15, 1 }
 0x152   : > { %v3121_v35 = vadd.f32 %v3120_v33, %v3119_v28  ;;  %v749_v38 = vadd.f32 %v4117_v32, %v4115_v25  ;;  %v768_v39 = vmul.f32 %v4117_v32, %v4117_v32  ;;  %v781_v56 = vrot.slane %v780_v44, 2 }
 0x153   : > { %v3122_v40 = vpop.f32.mrf.mxu0  ;;  %v746_v3 = vadd.f32 %v745_v55, %v744_v42  ;;  %v740_v28 = vrot.slane %v739_v14, 1 }
 0x154   : > { %v750_v46 = vrot.slane %v749_v38, 4  ;;  %v785_v47 = vadd.f32 %v768_v39, %v767_v37  ;;  %v4125_v51 = vadd.f32 %v3315_v49, %v3121_v35  ;;  %v782_v7 = vadd.f32 %v781_v56, %v780_v44 }
 0x155   : > { %v3123_v48 = vpop.f32.mrf.mxu0  ;;  %v747_v19 = vrot.slane %v746_v3, 1  ;;  %v777_v44 = vadd.f32 %v776_v29, %v775_v15  ;;  %v3500_v15 = vld [vmem:[#allocation7 + $0x60] sm:$0xff]   ;;  %v3511_v29 = vld [vmem:[#allocation7 + $0x8] sm:$0xff]  }
 0x156   : > { %v3124_v52 = vadd.f32 %v3123_v48, %v3122_v40  ;;  %v751_v53 = vadd.f32 %v750_v46, %v749_v38  ;;  %v786_v54 = vrot.slane %v785_v47, 4  ;;  %v769_v62 = vmul.f32 %v4125_v51, %v4125_v51 }
 0x157   : > { %v783_v22 = vrot.slane %v782_v7, 1  ;;  %v748_v33 = vadd.f32 %v747_v19, %v746_v3  ;;  %v741_v40 = vadd.f32 %v740_v28, %v739_v14  ;;  %v3495_v3 = vld [vmem:[#allocation7 + $0xb0] sm:$0xff]   ;;  %v3501_v14 = vld [vmem:[#allocation7 + $0xa0] sm:$0xff]   ;;  %v3503_v19 = vld [vmem:[#allocation7 + $0x58] sm:$0xff]  }
 0x158   : > { %v4127_v41 = vadd.f32 %v3316_v13, %v3124_v52  ;;  %v752_v58 = vrot.slane %v751_v53, 2  ;;  %v787_v59 = vadd.f32 %v786_v54, %v785_v47  ;;  %v3509_v28 = vld [vmem:[#allocation7 + $0x48] sm:$0xff]  }
 0x159   : > { %v784_v35 = vadd.f32 %v783_v22, %v782_v7  ;;  %v804_v47 = vsel %vm803_vm5, %v748_v33, %v741_v40  ;;  %v3494_v7 = vld [vmem:[#allocation7 + $0x70] sm:$0xff]   ;;  %v3514_v33 = vld [vmem:[#allocation7] sm:$0xff]  }
 0x15a   : > { %v756_v1 = vadd.f32 %v4127_v41, %v4125_v51  ;;  %v770_v49 = vmul.f32 %v4127_v41, %v4127_v41  ;;  %v788_v2 = vrot.slane %v787_v59, 2  ;;  %v753_v11 = vadd.f32 %v752_v58, %v751_v53  ;;  %v3506_v22 = vld [vmem:[#allocation7 + $0x50] sm:$0xff]  }
 0x15b   : > { %v815_v48 = vsel %vm814_vm6, %v784_v35, %v777_v44 }
 0x15c   : > { %v757_v8 = vrot.slane %v756_v1, 4  ;;  %v792_v10 = vadd.f32 %v770_v49, %v769_v62  ;;  %v789_v13 = vadd.f32 %v788_v2, %v787_v59  ;;  %v754_v24 = vrot.slane %v753_v11, 1  ;;  %v3491_v49 = vld [vmem:[#allocation7 + $0x78] sm:$0xff]  }
 0x15d   : > { %v3493_v2 = vld [vmem:[#allocation7 + $0x38] sm:$0xff]   ;;  %3137 = vmatprep.subr.bf16.mxu0 %v3491_v49 }
 0x15e   : > { %v758_v16 = vadd.f32 %v757_v8, %v756_v1  ;;  %v793_v18 = vrot.slane %v792_v10, 4  ;;  %v790_v27 = vrot.slane %v789_v13, 1  ;;  %v755_v38 = vadd.f32 %v754_v24, %v753_v11  ;;  %v3492_v1 = vld [vmem:[#allocation7 + $0xb8] sm:$0xff]   ;;  %3138 = vmatpush3.bf16.msra.mxu0 %v3493_v2  ;;  %v3496_v8 = vld [vmem:[#allocation7 + $0x30] sm:$0xff]   ;;  %v3497_v11 = vld [vmem:[#allocation7 + $0x68] sm:$0xff]  }
 0x15f   : > { %3317 = vmatprep.subr.bf16.mxu1 %v3492_v1  ;;  %3139 = vmatprep.subr.bf16.mxu0 %v3494_v7  ;;  %v3508_v24 = vld [vmem:[#allocation7 + $0x10] sm:$0xff]  }
 0x160   : > { %v759_v20 = vrot.slane %v758_v16, 2  ;;  %v794_v21 = vadd.f32 %v793_v18, %v792_v10  ;;  %v791_v39 = vadd.f32 %v790_v27, %v789_v13  ;;  %v806_v50 = vsel %vm4658_vm8, %v755_v38, %v804_v47  ;;  %3318 = vmatpush3.bf16.msra.mxu1 %v3492_v1  ;;  %v3498_v10 = vld [vmem:[#allocation7 + $0xa8] sm:$0xff]   ;;  %v3504_v18 = vld [vmem:[#allocation7 + $0x98] sm:$0xff]  }
 0x161   : > { %3319 = vmatprep.subr.bf16.mxu1 %v3495_v3  ;;  %v3499_v13 = vld [vmem:[#allocation7 + $0x28] sm:$0xff]   ;;  %v3741_v38 = vmov 1966171168  }
 0x162   : > { %v760_v30 = vadd.f32 %v759_v20, %v758_v16  ;;  %v795_v31 = vrot.slane %v794_v21, 2  ;;  %v817_v52 = vsel %vm4657_vm9, %v791_v39, %v815_v48  ;;  %3140 = vmatpush3.bf16.msra.mxu0 %v3496_v8  ;;  %v3502_v16 = vld [vmem:[#allocation7 + $0x20] sm:$0xff]   ;;  %v3505_v20 = vld [vmem:[#allocation7 + $0x18] sm:$0xff]   ;;  %v3510_v27 = vld [vmem:[#allocation7 + $0x88] sm:$0xff]   ;;  %v845_v39 = vunpack.c.l.s4 %v3741_v38 }
 0x163   : > { %3141 = vmatprep.subr.bf16.mxu0 %v3497_v11 }
 0x164   : > { %v761_v34 = vrot.slane %v760_v30, 1  ;;  %v796_v37 = vadd.f32 %v795_v31, %v794_v21  ;;  %3320 = vmatpush3.bf16.msra.mxu1 %v3495_v3  ;;  %v3507_v21 = vld [vmem:[#allocation7 + $0x90] sm:$0xff]   ;;  %v3512_v31 = vld [vmem:[#allocation7 + $0x40] sm:$0xff]   ;;  %v846_v44 = vunpack.c.0.s8 %v845_v39 }
 0x165   : > { %3321 = vmatprep.subr.bf16.mxu1 %v3498_v10 }
 0x166   : > { %v762_v42 = vadd.f32 %v761_v34, %v760_v30  ;;  %v797_v45 = vrot.slane %v796_v37, 1  ;;  %3142 = vmatpush3.bf16.msra.mxu0 %v3499_v13  ;;  %v3513_v30 = vld [vmem:[#allocation7 + $0x80] sm:$0xff]   ;;  %v4147_v47 = vsub.s32 %v846_v44, %v3907_v9 }
 0x167   : > { %3143 = vmatprep.subr.bf16.mxu0 %v3500_v15 }
 0x168   : > { %v798_v46 = vadd.f32 %v797_v45, %v796_v37  ;;  %v808_v53 = vsel %vm4656_vm10, %v762_v42, %v806_v50  ;;  %3322 = vmatpush3.bf16.msra.mxu1 %v3498_v10 }
 0x169   : > { %3323 = vmatprep.subr.bf16.mxu1 %v3501_v14 }
 0x16a   : > { %v819_v54 = vsel %vm4655_vm2, %v798_v46, %v817_v52  ;;  %3144 = vmatpush3.bf16.msra.mxu0 %v3502_v16 }
 0x16b   : > { %v822_v55 = vsel %vm4654_vm1, %v808_v53, %v819_v54  ;;  %3145 = vmatprep.subr.bf16.mxu0 %v3503_v19  ;;  %v4153_v54 = vsub.s32 0, %v3907_v9  ;;  %vm4702_vm1 = vcmp.lt.s32.totalorder %v3907_v9, 7 }
 0x16c   : > { %823 = vrot.lane.b32.xlu0 %v822_v55, %s3737_s18  ;;  %3324 = vmatpush3.bf16.msra.mxu1 %v3501_v14  ;;  %vm4703_vm2 = vmmov %vm4702_vm1 }
 0x16d   : > { %3325 = vmatprep.subr.bf16.mxu1 %v3504_v18  ;;  %vm4704_vm10 = vmmov %vm4702_vm1 }
 0x16e   : > { %3146 = vmatpush3.bf16.msra.mxu0 %v3505_v20  ;;  %vm4705_vm9 = vmmov %vm4702_vm1 }
 0x16f   : > { %3147 = vmatprep.subr.bf16.mxu0 %v3506_v22 }
 0x170   : > { %3326 = vmatpush3.bf16.msra.mxu1 %v3504_v18 }
 0x171   : > { %3327 = vmatprep.subr.bf16.mxu1 %v3507_v21 }
 0x172   : > { %3148 = vmatpush3.bf16.msra.mxu0 %v3508_v24 }
 0x173   : > { %3149 = vmatprep.subr.bf16.mxu0 %v3509_v28 }
 0x174   : > { %3328 = vmatpush3.bf16.msra.mxu1 %v3507_v21 }
 0x175   : > { %3329 = vmatprep.subr.bf16.mxu1 %v3510_v27 }
 0x176   : > { %3150 = vmatpush3.bf16.msra.mxu0 %v3511_v29 }
 0x177   : > { %3151 = vmatprep.subr.bf16.mxu0 %v3512_v31 }
 0x178   : > { %3330 = vmatpush3.bf16.msra.mxu1 %v3510_v27 }
 0x179   : > { %3331 = vmatprep.subr.bf16.mxu1 %v3513_v30 }
 0x17a   : > { %3152 = vmatpush3.bf16.msra.mxu0 %v3514_v33 }
 0x17c   : > { %3332 = vmatpush3.bf16.msra.mxu1 %v3513_v30 }
 0x1de   : > { %v824_v56 = vpop.permute.xlu0 %823 }
 0x1df   : > { %v825_v57 = vadd.f32 %v824_v56, %v822_v55 }
 0x1e1   : > { %826 = vrot.lane.b32.xlu0 %v825_v57, %s3738_s20 }
 0x253   : > { %v827_v58 = vpop.permute.xlu0 %826 }
 0x254   : > { %v828_v59 = vadd.f32 %v827_v58, %v825_v57 }
 0x256   : > { %829 = vrot.lane.b32.xlu1 %v828_v59, %s3739_s25 }
 0x2c8   : > { %v830_v61 = vpop.permute.xlu1 %829 }
 0x2c9   : > { %v831_v62 = vadd.f32 %v830_v61, %v828_v59 }
 0x2cb   : > { %832 = vrot.lane.b32.xlu1 %v831_v62, %s3740_s27 }
 0x33d   : > { %v833_v34 = vpop.permute.xlu1 %832 }
 0x33e   : > { %v834_v35 = vadd.f32 %v833_v34, %v831_v62 }
 0x340   : > { %v835_v37 = vmul.f32 0.00390625, %v834_v35 }
 0x342   : > { %v836_v40 = vmul.f32 %v835_v37, %v835_v37  ;;  %v850_v48 = vrot.slane %v835_v37, %v4147_v47 }
 0x344   : > { %v838_v42 = vrot.slane %v836_v40, 4  ;;  %v851_v50 = vcombine.high %v850_v48, %v850_v48  ;;  %v858_v52 = vrot.slane %v850_v48, %v4147_v47 }
 0x346   : > { %v840_v45 = vsub.f32 %v835_v37, %v838_v42  ;;  %v865_v53 = vrot.slane %v851_v50, %v4147_v47  ;;  %v866_v56 = vcombine.high %v858_v52, %v858_v52  ;;  %v871_v59 = vrot.slane %v858_v52, %v4153_v54 }
 0x348   : > { %v841_v46 = vadd.f32 1e-05, %v840_v45  ;;  %v867_v58 = vcombine.high %v865_v53, %v865_v53  ;;  %v875_v62 = vrot.slane %v865_v53, %v4153_v54  ;;  %v879_v1 = vrot.slane %v866_v56, %v4153_v54 }
 0x349   : > { %v888_v8 = vsub.f32 %v4099_v4, %v871_v59  ;;  %v889_v16 = vsub.f32 %v4095_v63, %v871_v59 }
 0x34a   : > { %3563 = vrsqrt.f32 %v841_v46  ;;  %v883_v3 = vrot.slane %v867_v58, %v4153_v54  ;;  %v890_v13 = vsub.f32 %v4097_v0, %v875_v62  ;;  %v891_v14 = vsub.f32 %v4101_v6, %v875_v62 }
 0x34b   : > { %v892_v15 = vsub.f32 %v4115_v25, %v879_v1  ;;  %v893_v22 = vsub.f32 %v4117_v32, %v879_v1 }
 0x34c   : > { %v894_v4 = vsub.f32 %v4125_v51, %v883_v3  ;;  %v895_v24 = vsub.f32 %v4127_v41, %v883_v3 }
 0x357   : > { %v3564_v55 = vpop.eup %3563 }
 0x358   : > { %v897_v57 = vcombine.high %v3564_v55, %v3564_v55 }
 0x35a   : > { %v904_v61 = vrot.slane %v897_v57, %v4147_v47 }
 0x35c   : > { %v905_v49 = vcombine.high %v904_v61, %v904_v61  ;;  %v912_v2 = vrot.slane %v904_v61, %v4147_v47 }
 0x35e   : > { %v919_v7 = vrot.slane %v905_v49, %v4147_v47  ;;  %v920_v10 = vcombine.high %v912_v2, %v912_v2  ;;  %v925_v11 = vrot.slane %v912_v2, %v4153_v54 }
 0x360   : > { %v921_v18 = vcombine.high %v919_v7, %v919_v7  ;;  %v929_v19 = vrot.slane %v919_v7, %v4153_v54  ;;  %v933_v20 = vrot.slane %v920_v10, %v4153_v54  ;;  %v942_v21 = vmul.f32 %v925_v11, %v888_v8 }
 0x361   : > { %v943_v27 = vmul.f32 %v925_v11, %v889_v16 }
 0x362   : > { %v937_v0 = vrot.slane %v921_v18, %v4153_v54  ;;  %v944_v6 = vmul.f32 %v929_v19, %v890_v13  ;;  %v945_v28 = vmul.f32 %v929_v19, %v891_v14  ;;  %v946_v25 = vmul.f32 %v933_v20, %v892_v15 }
 0x363   : > { %v950_v29 = vmax.f32 %v942_v21, 0.0  ;;  %v951_v63 = vmax.f32 %v943_v27, 0.0  ;;  %v947_v30 = vmul.f32 %v933_v20, %v893_v22 }
 0x364   : > { %v948_v31 = vmul.f32 %v937_v0, %v894_v4  ;;  %v949_v33 = vmul.f32 %v937_v0, %v895_v24  ;;  %v952_v34 = vmax.f32 %v944_v6, 0.0  ;;  %v953_v35 = vmax.f32 %v945_v28, 0.0 }
 0x365   : > { %v954_v37 = vmax.f32 %v946_v25, 0.0  ;;  %v1006_v38 = vrot.slane %v950_v29, 7  ;;  %v1007_v32 = vrot.slane %v951_v63, 7  ;;  %v1058_v39 = vpack.c.bf16 %v951_v63, %v950_v29 }
 0x366   : > { %v957_v51 = vmax.f32 %v949_v33, 0.0  ;;  %v1033_v40 = vrot.slane %v953_v35, 1  ;;  %v1030_v41 = vrot.slane %v950_v29, 1  ;;  %v1031_v42 = vrot.slane %v951_v63, 1 }
 0x367   : > { %1242 = vmatprep.mubr.bf16.mxu0 %v1058_v39  ;;  %v1032_v44 = vrot.slane %v952_v34, 1  ;;  %v1034_v45 = vrot.slane %v954_v37, 1  ;;  %v955_v46 = vmax.f32 %v947_v30, 0.0  ;;  %v1020_v50 = vsel %vm407_vm0, %v1006_v38, %v1007_v32 }
 0x368   : > { %v1013_v48 = vrot.slane %v957_v51, 7  ;;  %v1044_v52 = vsel %vm4702_vm1, %v1030_v41, %v1031_v42  ;;  %v956_v53 = vmax.f32 %v948_v31, 0.0  ;;  %v1059_v3 = vpack.c.bf16 %v953_v35, %v952_v34 }
 0x369   : > { %v1042_v55 = vsel %vm4703_vm2, %v1032_v44, %v1033_v40  ;;  %v1043_v56 = vsel %vm4704_vm10, %v1031_v42, %v1032_v44  ;;  %v1041_v57 = vsel %vm4705_vm9, %v1033_v40, %v1034_v45  ;;  %v1035_v58 = vrot.slane %v955_v46, 1  ;;  %vm4706_vm10 = vmmov %vm4702_vm1 }
 0x36a   : > { %v1021_v59 = vsel %vm407_vm0, %v1013_v48, %v1006_v38  ;;  %v2968_v61 = vpack.c.bf16 %v1043_v56, %v1044_v52  ;;  %v2971_v62 = vpack.c.bf16 %v1041_v57, %v1042_v55  ;;  %v1036_v1 = vrot.slane %v956_v53, 1  ;;  %vm4707_vm9 = vmmov %vm4702_vm1 }
 0x36b   : > { %v2956_v49 = vpack.c.bf16 %v1020_v50, %v1021_v59  ;;  %v1040_v2 = vsel %vm4702_vm1, %v1034_v45, %v1035_v58  ;;  %v1037_v8 = vrot.slane %v957_v51, 1  ;;  %v1008_v10 = vrot.slane %v952_v34, 7  ;;  %vm4708_vm2 = vmmov %vm4702_vm1 }
 0x36c   : > { %3333 = vmatprep.mubr.msk.bf16.mxu1 %vm3970_vm7, %v2968_v61  ;;  %v1039_v7 = vsel %vm4706_vm10, %v1035_v58, %v1036_v1  ;;  %v1009_v11 = vrot.slane %v953_v35, 7  ;;  %v1060_v21 = vpack.c.bf16 %v955_v46, %v954_v37  ;;  %v1010_v22 = vrot.slane %v954_v37, 7 }
 0x36d   : > { %3334 = vmatmul.mubr.msk.bf16.vlgmr.msra.gmra.mxu1 %vm4008_vm12, %v2971_v62  ;;  %2957 = vmatmul.mubr.msk.bf16.vlgmr.msra.gmra.mxu0 %vm3996_vm11, %v2956_v49  ;;  %v2974_v13 = vpack.c.bf16 %v1039_v7, %v1040_v2  ;;  %v1038_v14 = vsel %vm4707_vm9, %v1036_v1, %v1037_v8  ;;  %v1045_v15 = vsel %vm4708_vm2, %v1037_v8, %v1030_v41  ;;  %v1011_v4 = vrot.slane %v955_v46, 7 }
 0x36e   : > { %1250 = vmatprep.mubr.bf16.mxu0 %v1059_v3  ;;  %v1018_v16 = vsel %vm407_vm0, %v1008_v10, %v1009_v11  ;;  %v1019_v18 = vsel %vm407_vm0, %v1007_v32, %v1008_v10  ;;  %v2977_v19 = vpack.c.bf16 %v1045_v15, %v1038_v14  ;;  %v1017_v27 = vsel %vm407_vm0, %v1009_v11, %v1010_v22 }
 0x36f   : > { %3337 = vmatprep.mubr.msk.bf16.mxu1 %vm4029_vm14, %v2974_v13  ;;  %v2959_v20 = vpack.c.bf16 %v1018_v16, %v1019_v18  ;;  %v1016_v24 = vsel %vm407_vm0, %v1010_v22, %v1011_v4  ;;  %v1061_v6 = vpack.c.bf16 %v957_v51, %v956_v53  ;;  %v1012_v28 = vrot.slane %v956_v53, 7 }
 0x370   : > { %v2962_v0 = vpack.c.bf16 %v1016_v24, %v1017_v27  ;;  %vm4709_vm1 = vcmask 1046534   ;;  %vm4710_vm10 = vcmask 1043459   ;;  %vm4711_vm9 = vcmask 1047559  }
 0x371   : > { %v1014_v25 = vsel %vm407_vm0, %v1012_v28, %v1013_v48  ;;  %v1015_v29 = vsel %vm407_vm0, %v1011_v4, %v1012_v28  ;;  %vm4712_vm2 = vcmask 1043456  }
 0x372   : > { %v2965_v63 = vpack.c.bf16 %v1014_v25, %v1015_v29 }
 0x375   : > { %3338 = vmatmul.mubr.msk.bf16.gmra.mxu1 %vm4039_vm15, %v2977_v19  ;;  %2960 = vmatmul.mubr.msk.bf16.gmra.mxu0 %vm4019_vm13, %v2959_v20 }
 0x376   : > { %1258 = vmatprep.mubr.bf16.mxu0 %v1060_v21 }
 0x37d   : > { %2963 = vmatmul.mubr.msk.bf16.gmra.mxu0 %vm4065_vm3, %v2962_v0 }
 0x37e   : > { %1266 = vmatprep.mubr.bf16.mxu0 %v1061_v6 }
 0x385   : > { %2966 = vmatmul.mubr.msk.bf16.gmra.mxu0 %vm4081_vm4, %v2965_v63 }
 0x42d   : > { %v3335_v30 = vpop.f32.mrf.mxu1  ;;  %v3153_v31 = vpop.f32.mrf.mxu0 }
 0x42f   : > { %v1309_v33 = vpop.f32.mrf.mxu1  ;;  %v3154_v34 = vpop.f32.mrf.mxu0 }
 0x430   : > { %v3155_v42 = vadd.f32 %v3154_v34, %v3153_v31 }
 0x431   : > { %v3336_v35 = vpop.f32.mrf.mxu1  ;;  %v3156_v37 = vpop.f32.mrf.mxu0 }
 0x432   : > { %v4226_v53 = vadd.f32 %v3155_v42, %v1309_v33 }
 0x433   : > { %v3157_v38 = vpop.f32.mrf.mxu0  ;;  %v1312_v32 = vpop.f32.mrf.mxu1 }
 0x434   : > { %v3158_v51 = vadd.f32 %v3157_v38, %v3156_v37  ;;  %v1368_v1 = vmul.f32 %v4226_v53, %v4226_v53 }
 0x435   : > { %v3159_v39 = vpop.f32.mrf.mxu0  ;;  %v3339_v44 = vpop.f32.mrf.mxu1 }
 0x436   : > { %v4222_v46 = vadd.f32 %v3158_v51, %v1312_v32 }
 0x437   : > { %v3160_v40 = vpop.f32.mrf.mxu0  ;;  %v1325_v55 = vpop.f32.mrf.mxu1 }
 0x438   : > { %v3161_v41 = vadd.f32 %v3160_v40, %v3159_v39  ;;  %v1369_v58 = vmul.f32 %v4222_v46, %v4222_v46  ;;  %v1340_v10 = vadd.f32 %v4222_v46, %v4226_v53 }
 0x439   : > { %v3162_v45 = vpop.f32.mrf.mxu0  ;;  %v3340_v49 = vpop.f32.mrf.mxu1 }
 0x43a   : > { %v4224_v50 = vadd.f32 %v3335_v30, %v3161_v41  ;;  %v1376_v11 = vadd.f32 %v1369_v58, %v1368_v1  ;;  %v1341_v22 = vrot.slane %v1340_v10, 4 }
 0x43b   : > { %v3163_v48 = vpop.f32.mrf.mxu0  ;;  %v1328_v16 = vpop.f32.mrf.mxu1 }
 0x43c   : > { %v3164_v52 = vadd.f32 %v3163_v48, %v3162_v45  ;;  %v1370_v61 = vmul.f32 %v4224_v50, %v4224_v50  ;;  %v1377_v4 = vrot.slane %v1376_v11, 4  ;;  %v1342_v33 = vadd.f32 %v1341_v22, %v1340_v10 }
 0x43d   : > { %v3165_v56 = vpop.f32.mrf.mxu0 }
 0x43e   : > { %v4228_v57 = vadd.f32 %v3336_v35, %v3164_v52  ;;  %v1378_v34 = vadd.f32 %v1377_v4, %v1376_v11  ;;  %v1343_v45 = vrot.slane %v1342_v33, 2 }
 0x43f   : > { %v3166_v59 = vpop.f32.mrf.mxu0 }
 0x440   : > { %v1371_v62 = vmul.f32 %v4228_v57, %v4228_v57  ;;  %v3167_v2 = vadd.f32 %v3166_v59, %v3165_v56  ;;  %v1347_v7 = vadd.f32 %v4228_v57, %v4224_v50  ;;  %v1379_v48 = vrot.slane %v1378_v34, 2 }
 0x441   : > { %v3168_v3 = vpop.f32.mrf.mxu0 }
 0x442   : > { %v1383_v8 = vadd.f32 %v1371_v62, %v1370_v61  ;;  %v4242_v14 = vadd.f32 %v3167_v2, %v1325_v55  ;;  %v1348_v19 = vrot.slane %v1347_v7, 4 }
 0x443   : > { %v3169_v13 = vpop.f32.mrf.mxu0 }
 0x444   : > { %v3170_v15 = vadd.f32 %v3169_v13, %v3168_v3  ;;  %v1384_v20 = vrot.slane %v1383_v8, 4  ;;  %v1372_v27 = vmul.f32 %v4242_v14, %v4242_v14  ;;  %v1349_v29 = vadd.f32 %v1348_v19, %v1347_v7 }
 0x445   : > { %v3171_v18 = vpop.f32.mrf.mxu0  ;;  %v1344_v3 = vadd.f32 %v1343_v45, %v1342_v33  ;;  %v1380_v7 = vadd.f32 %v1379_v48, %v1378_v34 }
 0x446   : > { %v4244_v21 = vadd.f32 %v3170_v15, %v1328_v16  ;;  %v1385_v63 = vadd.f32 %v1384_v20, %v1383_v8  ;;  %v1350_v51 = vrot.slane %v1349_v29, 2 }
 0x447   : > { %v3172_v24 = vpop.f32.mrf.mxu0  ;;  %v1345_v20 = vrot.slane %v1344_v3, 1  ;;  %v1381_v4 = vrot.slane %v1380_v7, 1 }
 0x448   : > { %v1354_v0 = vadd.f32 %v4244_v21, %v4242_v14  ;;  %v1373_v6 = vmul.f32 %v4244_v21, %v4244_v21  ;;  %v3173_v28 = vadd.f32 %v3172_v24, %v3171_v18  ;;  %v1386_v40 = vrot.slane %v1385_v63, 2 }
 0x449   : > { %v3174_v25 = vpop.f32.mrf.mxu0  ;;  %v1351_v59 = vadd.f32 %v1350_v51, %v1349_v29 }
 0x44a   : > { %v1355_v30 = vrot.slane %v1354_v0, 4  ;;  %v1390_v31 = vadd.f32 %v1373_v6, %v1372_v27  ;;  %v4252_v32 = vadd.f32 %v3339_v44, %v3173_v28  ;;  %v1387_v61 = vadd.f32 %v1386_v40, %v1385_v63 }
 0x44b   : > { %v3175_v35 = vpop.f32.mrf.mxu0  ;;  %v1352_v11 = vrot.slane %v1351_v59, 1  ;;  %v1346_v63 = vadd.f32 %v1345_v20, %v1344_v3  ;;  %v3521_v3 = vld [vmem:[#allocation5 + $0x128] sm:$0xff]   ;;  %v3532_v20 = vld [vmem:[#allocation5 + $0xd0] sm:$0xff]  }
 0x44c   : > { %v1356_v37 = vadd.f32 %v1355_v30, %v1354_v0  ;;  %v1391_v38 = vrot.slane %v1390_v31, 4  ;;  %v3176_v39 = vadd.f32 %v3175_v35, %v3174_v25  ;;  %v1374_v56 = vmul.f32 %v4252_v32, %v4252_v32 }
 0x44d   : > { %v1388_v16 = vrot.slane %v1387_v61, 1  ;;  %v1353_v27 = vadd.f32 %v1352_v11, %v1351_v59  ;;  %v3515_v59 = vld [vmem:[#allocation5 + $0x138] sm:$0xff]   ;;  %v3526_v11 = vld [vmem:[#allocation5 + $0xe0] sm:$0xff]  }
 0x44e   : > { %v1392_v41 = vadd.f32 %v1391_v38, %v1390_v31  ;;  %v4254_v42 = vadd.f32 %v3340_v49, %v3176_v39  ;;  %v1357_v52 = vrot.slane %v1356_v37, 2  ;;  %v1382_v31 = vadd.f32 %v1381_v4, %v1380_v7  ;;  %3189 = vmatprep.subr.bf16.mxu0 %v3515_v59  ;;  %v3523_v7 = vld [vmem:[#allocation5 + $0xe8] sm:$0xff]  }
 0x44f   : > { %v1389_v6 = vadd.f32 %v1388_v16, %v1387_v61  ;;  %v1408_v35 = vsel %vm803_vm5, %v1353_v27, %v1346_v63  ;;  %v3517_v61 = vld [vmem:[#allocation5 + $0xf8] sm:$0xff]   ;;  %v3534_v4 = vld [vmem:[#allocation5 + $0x148] sm:$0xff]   ;;  %v3537_v27 = vld [vmem:[#allocation5 + $0x140] sm:$0xff]  }
 0x450   : > { %v1393_v55 = vrot.slane %v1392_v41, 2  ;;  %v1361_v58 = vadd.f32 %v4254_v42, %v4252_v32  ;;  %v1375_v44 = vmul.f32 %v4254_v42, %v4254_v42  ;;  %v1358_v2 = vadd.f32 %v1357_v52, %v1356_v37  ;;  %3190 = vmatpush3.bf16.msra.mxu0 %v3517_v61  ;;  %v3529_v16 = vld [vmem:[#allocation5 + $0xd8] sm:$0xff]  }
 0x451   : > { %v1416_v37 = vsel %vm814_vm6, %v1389_v6, %v1382_v31  ;;  %v3538_v6 = vld [vmem:[#allocation5 + $0xc0] sm:$0xff]  }
 0x452   : > { %v1362_v62 = vrot.slane %v1361_v58, 4  ;;  %v1397_v1 = vadd.f32 %v1375_v44, %v1374_v56  ;;  %v1394_v49 = vadd.f32 %v1393_v55, %v1392_v41  ;;  %v1359_v18 = vrot.slane %v1358_v2, 1  ;;  %v3516_v44 = vld [vmem:[#allocation5 + $0x178] sm:$0xff]  }
 0x453   : > { %3341 = vmatprep.subr.bf16.mxu1 %v3516_v44 }
 0x454   : > { %v1363_v8 = vadd.f32 %v1362_v62, %v1361_v58  ;;  %v1398_v10 = vrot.slane %v1397_v1, 4  ;;  %v1395_v19 = vrot.slane %v1394_v49, 1  ;;  %v1360_v25 = vadd.f32 %v1359_v18, %v1358_v2  ;;  %3342 = vmatpush3.bf16.msra.mxu1 %v3516_v44  ;;  %v3519_v62 = vld [vmem:[#allocation5 + $0x170] sm:$0xff]  }
 0x455   : > { %3343 = vmatprep.subr.bf16.mxu1 %v3519_v62  ;;  %v3520_v2 = vld [vmem:[#allocation5 + $0xf0] sm:$0xff]  }
 0x456   : > { %v1364_v13 = vrot.slane %v1363_v8, 2  ;;  %v1399_v15 = vadd.f32 %v1398_v10, %v1397_v1  ;;  %v1396_v29 = vadd.f32 %v1395_v19, %v1394_v49  ;;  %v1409_v38 = vsel %vm4658_vm8, %v1360_v25, %v1408_v35  ;;  %v3518_v1 = vld [vmem:[#allocation5 + $0x130] sm:$0xff]   ;;  %v3522_v49 = vld [vmem:[#allocation5 + $0x168] sm:$0xff]   ;;  %v3524_v10 = vld [vmem:[#allocation5 + $0x120] sm:$0xff]  }
 0x457   : > { %3191 = vmatprep.subr.bf16.mxu0 %v3518_v1  ;;  %v3531_v18 = vld [vmem:[#allocation5 + $0x150] sm:$0xff]  }
 0x458   : > { %v1365_v22 = vadd.f32 %v1364_v13, %v1363_v8  ;;  %v1400_v24 = vrot.slane %v1399_v15, 2  ;;  %v1417_v39 = vsel %vm4709_vm1, %v1396_v29, %v1416_v37  ;;  %3344 = vmatpush3.bf16.msra.mxu1 %v3519_v62  ;;  %3192 = vmatpush3.bf16.msra.mxu0 %v3520_v2  ;;  %v3525_v8 = vld [vmem:[#allocation5 + $0x160] sm:$0xff]   ;;  %v3528_v13 = vld [vmem:[#allocation5 + $0x158] sm:$0xff]   ;;  %v3530_v19 = vld [vmem:[#allocation5 + $0x110] sm:$0xff]   ;;  %vm4713_vm1 = vcmp.lt.s32.totalorder %v3907_v9, 7 }
 0x459   : > { %3345 = vmatprep.subr.bf16.mxu1 %v3522_v49  ;;  %3193 = vmatprep.subr.bf16.mxu0 %v3521_v3  ;;  %vm4717_vm8 = vmmov %vm4713_vm1 }
 0x45a   : > { %v1366_v0 = vrot.slane %v1365_v22, 1  ;;  %v1401_v28 = vadd.f32 %v1400_v24, %v1399_v15  ;;  %v3527_v15 = vld [vmem:[#allocation5 + $0x118] sm:$0xff]   ;;  %v3535_v24 = vld [vmem:[#allocation5 + $0xc8] sm:$0xff]  }
 0x45c   : > { %v1367_v30 = vadd.f32 %v1366_v0, %v1365_v22  ;;  %v1402_v33 = vrot.slane %v1401_v28, 1  ;;  %3346 = vmatpush3.bf16.msra.mxu1 %v3522_v49  ;;  %3194 = vmatpush3.bf16.msra.mxu0 %v3523_v7  ;;  %v3533_v22 = vld [vmem:[#allocation5 + $0x108] sm:$0xff]   ;;  %v3536_v0 = vld [vmem:[#allocation5 + $0x100] sm:$0xff]  }
 0x45d   : > { %3347 = vmatprep.subr.bf16.mxu1 %v3525_v8  ;;  %3195 = vmatprep.subr.bf16.mxu0 %v3524_v10 }
 0x45e   : > { %v1403_v34 = vadd.f32 %v1402_v33, %v1401_v28  ;;  %v1410_v51 = vsel %vm4710_vm10, %v1367_v30, %v1409_v38  ;;  %vm4714_vm10 = vmmov %vm4713_vm1 }
 0x460   : > { %v1418_v40 = vsel %vm4711_vm9, %v1403_v34, %v1417_v39  ;;  %3348 = vmatpush3.bf16.msra.mxu1 %v3525_v8  ;;  %3196 = vmatpush3.bf16.msra.mxu0 %v3526_v11  ;;  %vm4715_vm9 = vmmov %vm4713_vm1 }
 0x461   : > { %v1420_v41 = vsel %vm4712_vm2, %v1410_v51, %v1418_v40  ;;  %3349 = vmatprep.subr.bf16.mxu1 %v3528_v13  ;;  %3197 = vmatprep.subr.bf16.mxu0 %v3527_v15  ;;  %vm4716_vm2 = vmmov %vm4713_vm1 }
 0x462   : > { %1421 = vrot.lane.b32.xlu0 %v1420_v41, %s3737_s18 }
 0x464   : > { %3350 = vmatpush3.bf16.msra.mxu1 %v3528_v13  ;;  %3198 = vmatpush3.bf16.msra.mxu0 %v3529_v16 }
 0x465   : > { %3351 = vmatprep.subr.bf16.mxu1 %v3531_v18  ;;  %3199 = vmatprep.subr.bf16.mxu0 %v3530_v19 }
 0x468   : > { %3352 = vmatpush3.bf16.msra.mxu1 %v3531_v18  ;;  %3200 = vmatpush3.bf16.msra.mxu0 %v3532_v20  ;;  %v3571_v20 = vld [vmem:[%s3897_s6] sm:$0xff] }
 0x469   : > { %3353 = vmatprep.subr.bf16.mxu1 %v3534_v4  ;;  %3201 = vmatprep.subr.bf16.mxu0 %v3533_v22 }
 0x46c   : > { %3354 = vmatpush3.bf16.msra.mxu1 %v3534_v4  ;;  %3202 = vmatpush3.bf16.msra.mxu0 %v3535_v24  ;;  %v3572_v4 = vld [vmem:[%s3897_s6 + $0x8] sm:$0xff] }
 0x46d   : > { %3355 = vmatprep.subr.bf16.mxu1 %v3537_v27  ;;  %3203 = vmatprep.subr.bf16.mxu0 %v3536_v0  ;;  %v3574_v0 = vld [vmem:[%s3897_s6 + $0x18] sm:$0xff] }
 0x470   : > { %3356 = vmatpush3.bf16.msra.mxu1 %v3537_v27  ;;  %3204 = vmatpush3.bf16.msra.mxu0 %v3538_v6 }
 0x4d4   : > { %v1422_v45 = vpop.permute.xlu0 %1421 }
 0x4d5   : > { %v1423_v48 = vadd.f32 %v1422_v45, %v1420_v41 }
 0x4d7   : > { %1424 = vrot.lane.b32.xlu1 %v1423_v48, %s3738_s20 }
 0x549   : > { %v1425_v52 = vpop.permute.xlu1 %1424 }
 0x54a   : > { %v1426_v55 = vadd.f32 %v1425_v52, %v1423_v48 }
 0x54c   : > { %1427 = vrot.lane.b32.xlu0 %v1426_v55, %s3739_s25 }
 0x5be   : > { %v1428_v56 = vpop.permute.xlu0 %1427 }
 0x5bf   : > { %v1429_v58 = vadd.f32 %v1428_v56, %v1426_v55 }
 0x5c1   : > { %1430 = vrot.lane.b32.xlu1 %v1429_v58, %s3740_s27 }
 0x633   : > { %v1431_v28 = vpop.permute.xlu1 %1430 }
 0x634   : > { %v1432_v25 = vadd.f32 %v1431_v28, %v1429_v58  ;;  %v3575_v28 = vld [vmem:[%s3897_s6 + $0x20] sm:$0xff] }
 0x636   : > { %v1433_v29 = vmul.f32 0.00390625, %v1432_v25 }
 0x638   : > { %v1434_v63 = vmul.f32 %v1433_v29, %v1433_v29  ;;  %v1448_v34 = vrot.slane %v1433_v29, %v4147_v47 }
 0x63a   : > { %v1436_v30 = vrot.slane %v1434_v63, 4  ;;  %v1449_v35 = vcombine.high %v1448_v34, %v1448_v34  ;;  %v1456_v37 = vrot.slane %v1448_v34, %v4147_v47 }
 0x63c   : > { %v1438_v31 = vsub.f32 %v1433_v29, %v1436_v30  ;;  %v1463_v38 = vrot.slane %v1449_v35, %v4147_v47  ;;  %v1464_v51 = vcombine.high %v1456_v37, %v1456_v37  ;;  %v1469_v45 = vrot.slane %v1456_v37, %v4153_v54  ;;  %v3576_v29 = vld [vmem:[%s3897_s6 + $0x28] sm:$0xff]  ;;  %v3578_v35 = vld [vmem:[%s3897_s6 + $0x38] sm:$0xff] }
 0x63e   : > { %v1439_v33 = vadd.f32 1e-05, %v1438_v31  ;;  %v1465_v41 = vcombine.high %v1463_v38, %v1463_v38  ;;  %v1473_v52 = vrot.slane %v1463_v38, %v4153_v54  ;;  %v1477_v55 = vrot.slane %v1464_v51, %v4153_v54 }
 0x63f   : > { %v1486_v59 = vsub.f32 %v4226_v53, %v1469_v45  ;;  %v1487_v2 = vsub.f32 %v4222_v46, %v1469_v45 }
 0x640   : > { %3565 = vrsqrt.f32 %v1439_v33  ;;  %v1481_v44 = vrot.slane %v1465_v41, %v4153_v54  ;;  %v1488_v49 = vsub.f32 %v4224_v50, %v1473_v52  ;;  %v1489_v3 = vsub.f32 %v4228_v57, %v1473_v52  ;;  %v3577_v33 = vld [vmem:[%s3897_s6 + $0x30] sm:$0xff] }
 0x641   : > { %v1490_v7 = vsub.f32 %v4242_v14, %v1477_v55  ;;  %v1491_v13 = vsub.f32 %v4244_v21, %v1477_v55 }
 0x642   : > { %v1492_v15 = vsub.f32 %v4252_v32, %v1481_v44  ;;  %v1493_v46 = vsub.f32 %v4254_v42, %v1481_v44  ;;  %v3573_v42 = vld [vmem:[%s3897_s6 + $0x10] sm:$0xff] }
 0x64d   : > { %v3566_v39 = vpop.eup %3565 }
 0x64e   : > { %v1495_v40 = vcombine.high %v3566_v39, %v3566_v39 }
 0x650   : > { %v1502_v48 = vrot.slane %v1495_v40, %v4147_v47 }
 0x652   : > { %v1503_v56 = vcombine.high %v1502_v48, %v1502_v48  ;;  %v1510_v58 = vrot.slane %v1502_v48, %v4147_v47 }
 0x654   : > { %v1517_v61 = vrot.slane %v1503_v56, %v4147_v47  ;;  %v1518_v62 = vcombine.high %v1510_v58, %v1510_v58  ;;  %v1523_v1 = vrot.slane %v1510_v58, %v4153_v54 }
 0x656   : > { %v1519_v8 = vcombine.high %v1517_v61, %v1517_v61  ;;  %v1527_v10 = vrot.slane %v1517_v61, %v4153_v54  ;;  %v1531_v53 = vrot.slane %v1518_v62, %v4153_v54  ;;  %v1540_v11 = vmul.f32 %v1523_v1, %v1486_v59 }
 0x657   : > { %v1541_v50 = vmul.f32 %v1523_v1, %v1487_v2 }
 0x658   : > { %v1535_v57 = vrot.slane %v1519_v8, %v4153_v54  ;;  %v1542_v14 = vmul.f32 %v1527_v10, %v1488_v49  ;;  %v1543_v16 = vmul.f32 %v1527_v10, %v1489_v3  ;;  %v1544_v18 = vmul.f32 %v1531_v53, %v1490_v7 }
 0x659   : > { %v1545_v19 = vmul.f32 %v1531_v53, %v1491_v13  ;;  %v4296_v22 = vadd.f32 %v3571_v20, %v1540_v11  ;;  %v4299_v21 = vadd.f32 %v3572_v4, %v1541_v50 }
 0x65a   : > { %v1546_v32 = vmul.f32 %v1535_v57, %v1492_v15  ;;  %v1547_v24 = vmul.f32 %v1535_v57, %v1493_v46  ;;  %v4302_v27 = vadd.f32 %v3573_v42, %v1542_v14  ;;  %v4305_v6 = vadd.f32 %v3574_v0, %v1543_v16 }
 0x65b   : > { %v4308_v25 = vadd.f32 %v3575_v28, %v1544_v18  ;;  %v4311_v63 = vadd.f32 %v3576_v29, %v1545_v19  ;;  %v1605_v30 = vrot.slane %v4296_v22, 7  ;;  %v1606_v31 = vrot.slane %v4299_v21, 7 }
 0x65c   : > { %v4316_v34 = vadd.f32 %v3577_v33, %v1546_v32  ;;  %v4319_v37 = vadd.f32 %v3578_v35, %v1547_v24  ;;  %v1657_v38 = vpack.c.bf16 %v4299_v21, %v4296_v22  ;;  %v1629_v39 = vrot.slane %v4296_v22, 1 }
 0x65d   : > { %v1630_v51 = vrot.slane %v4299_v21, 1  ;;  %v1631_v40 = vrot.slane %v4302_v27, 1  ;;  %v1632_v41 = vrot.slane %v4305_v6, 1  ;;  %v1633_v45 = vrot.slane %v4308_v25, 1 }
 0x65e   : > { %1841 = vmatprep.mubr.bf16.mxu0 %v1657_v38  ;;  %v1612_v48 = vrot.slane %v4319_v37, 7  ;;  %v1619_v52 = vsel %vm407_vm0, %v1605_v30, %v1606_v31  ;;  %v1634_v55 = vrot.slane %v4311_v63, 1  ;;  %v1635_v56 = vrot.slane %v4316_v34, 1 }
 0x65f   : > { %v1641_v58 = vsel %vm4713_vm1, %v1631_v40, %v1632_v41  ;;  %v1642_v44 = vsel %vm4714_vm10, %v1630_v51, %v1631_v40  ;;  %v1643_v59 = vsel %vm4715_vm9, %v1629_v39, %v1630_v51  ;;  %v1640_v61 = vsel %vm4716_vm2, %v1632_v41, %v1633_v45  ;;  %vm4719_vm10 = vmmov %vm4713_vm1 }
 0x660   : > { %v3016_v62 = vpack.c.bf16 %v1642_v44, %v1643_v59  ;;  %v3019_v1 = vpack.c.bf16 %v1640_v61, %v1641_v58  ;;  %v1620_v2 = vsel %vm407_vm0, %v1612_v48, %v1605_v30  ;;  %v1638_v49 = vsel %vm4717_vm8, %v1634_v55, %v1635_v56  ;;  %vm4718_vm8 = vmmov %vm4713_vm1 }
 0x661   : > { %v3004_v3 = vpack.c.bf16 %v1619_v52, %v1620_v2  ;;  %v1639_v7 = vsel %vm4713_vm1, %v1633_v45, %v1634_v55  ;;  %v1658_v8 = vpack.c.bf16 %v4305_v6, %v4302_v27  ;;  %v1636_v53 = vrot.slane %v4319_v37, 1 }
 0x662   : > { %3357 = vmatprep.mubr.msk.bf16.mxu1 %vm3970_vm7, %v3016_v62  ;;  %v3022_v10 = vpack.c.bf16 %v1638_v49, %v1639_v7  ;;  %v1607_v11 = vrot.slane %v4302_v27, 7  ;;  %v1608_v13 = vrot.slane %v4305_v6, 7  ;;  %v1659_v18 = vpack.c.bf16 %v4311_v63, %v4308_v25 }
 0x663   : > { %3358 = vmatmul.mubr.msk.bf16.vlgmr.msra.gmra.mxu1 %vm4008_vm12, %v3019_v1  ;;  %3005 = vmatmul.mubr.msk.bf16.vlgmr.msra.gmra.mxu0 %vm3996_vm11, %v3004_v3  ;;  %v1637_v15 = vsel %vm4718_vm8, %v1635_v56, %v1636_v53  ;;  %v1644_v46 = vsel %vm4719_vm10, %v1636_v53, %v1629_v39  ;;  %v1609_v19 = vrot.slane %v4308_v25, 7  ;;  %v1610_v20 = vrot.slane %v4311_v63, 7 }
 0x664   : > { %3361 = vmatprep.mubr.msk.bf16.mxu1 %vm4029_vm14, %v3022_v10  ;;  %1849 = vmatprep.mubr.bf16.mxu0 %v1658_v8  ;;  %v1617_v50 = vsel %vm407_vm0, %v1607_v11, %v1608_v13  ;;  %v1618_v57 = vsel %vm407_vm0, %v1606_v31, %v1607_v11  ;;  %v3025_v14 = vpack.c.bf16 %v1644_v46, %v1637_v15  ;;  %v1611_v0 = vrot.slane %v4316_v34, 7 }
 0x665   : > { %v3007_v16 = vpack.c.bf16 %v1617_v50, %v1618_v57  ;;  %v1615_v4 = vsel %vm407_vm0, %v1609_v19, %v1610_v20  ;;  %v1616_v32 = vsel %vm407_vm0, %v1608_v13, %v1609_v19  ;;  %v1660_v42 = vpack.c.bf16 %v4319_v37, %v4316_v34 }
 0x666   : > { %v3010_v24 = vpack.c.bf16 %v1615_v4, %v1616_v32  ;;  %v1613_v28 = vsel %vm407_vm0, %v1611_v0, %v1612_v48  ;;  %v1614_v29 = vsel %vm407_vm0, %v1610_v20, %v1611_v0  ;;  %vm4720_vm9 = vcmask 1042434  }
 0x667   : > { %v3013_v30 = vpack.c.bf16 %v1613_v28, %v1614_v29  ;;  %vm4721_vm2 = vcmask 1046534   ;;  %vm4722_vm1 = vcmask 1043459   ;;  %vm4723_vm8 = vcmask 1047559  }
 0x668   : > { %vm4724_vm10 = vcmask 1043456  }
 0x66b   : > { %3362 = vmatmul.mubr.msk.bf16.gmra.mxu1 %vm4039_vm15, %v3025_v14  ;;  %3008 = vmatmul.mubr.msk.bf16.gmra.mxu0 %vm4019_vm13, %v3007_v16 }
 0x66c   : > { %1857 = vmatprep.mubr.bf16.mxu0 %v1659_v18 }
 0x673   : > { %3011 = vmatmul.mubr.msk.bf16.gmra.mxu0 %vm4065_vm3, %v3010_v24 }
 0x674   : > { %1865 = vmatprep.mubr.bf16.mxu0 %v1660_v42 }
 0x67b   : > { %3014 = vmatmul.mubr.msk.bf16.gmra.mxu0 %vm4081_vm4, %v3013_v30 }
 0x723   : > { %v3359_v31 = vpop.f32.mrf.mxu1  ;;  %v3205_v33 = vpop.f32.mrf.mxu0 }
 0x725   : > { %v1908_v35 = vpop.f32.mrf.mxu1  ;;  %v3206_v38 = vpop.f32.mrf.mxu0 }
 0x726   : > { %v3207_v48 = vadd.f32 %v3206_v38, %v3205_v33 }
 0x727   : > { %v3360_v39 = vpop.f32.mrf.mxu1  ;;  %v3208_v51 = vpop.f32.mrf.mxu0 }
 0x728   : > { %v4395_v2 = vadd.f32 %v3207_v48, %v1908_v35 }
 0x729   : > { %v3209_v40 = vpop.f32.mrf.mxu0  ;;  %v1911_v41 = vpop.f32.mrf.mxu1 }
 0x72a   : > { %v3210_v52 = vadd.f32 %v3209_v40, %v3208_v51  ;;  %v1967_v13 = vmul.f32 %v4395_v2, %v4395_v2 }
 0x72b   : > { %v3211_v45 = vpop.f32.mrf.mxu0  ;;  %v3363_v58 = vpop.f32.mrf.mxu1 }
 0x72c   : > { %v4391_v59 = vadd.f32 %v3210_v52, %v1911_v41 }
 0x72d   : > { %v3212_v55 = vpop.f32.mrf.mxu0  ;;  %v1924_v49 = vpop.f32.mrf.mxu1 }
 0x72e   : > { %v3213_v56 = vadd.f32 %v3212_v55, %v3211_v45  ;;  %v1968_v8 = vmul.f32 %v4391_v59, %v4391_v59  ;;  %v1939_v16 = vadd.f32 %v4391_v59, %v4395_v2 }
 0x72f   : > { %v3214_v44 = vpop.f32.mrf.mxu0  ;;  %v3364_v15 = vpop.f32.mrf.mxu1 }
 0x730   : > { %v4393_v62 = vadd.f32 %v3359_v31, %v3213_v56  ;;  %v1975_v18 = vadd.f32 %v1968_v8, %v1967_v13  ;;  %v1940_v29 = vrot.slane %v1939_v16, 4 }
 0x731   : > { %v3215_v61 = vpop.f32.mrf.mxu0  ;;  %v1927_v32 = vpop.f32.mrf.mxu1 }
 0x732   : > { %v3216_v1 = vadd.f32 %v3215_v61, %v3214_v44  ;;  %v1969_v53 = vmul.f32 %v4393_v62, %v4393_v62  ;;  %v1976_v30 = vrot.slane %v1975_v18, 4  ;;  %v1941_v55 = vadd.f32 %v1940_v29, %v1939_v16 }
 0x733   : > { %v3217_v3 = vpop.f32.mrf.mxu0 }
 0x734   : > { %v4397_v7 = vadd.f32 %v3360_v39, %v3216_v1  ;;  %v1977_v56 = vadd.f32 %v1976_v30, %v1975_v18 }
 0x735   : > { %v3218_v10 = vpop.f32.mrf.mxu0 }
 0x736   : > { %v1970_v11 = vmul.f32 %v4397_v7, %v4397_v7  ;;  %v3219_v46 = vadd.f32 %v3218_v10, %v3217_v3  ;;  %v1946_v57 = vadd.f32 %v4397_v7, %v4393_v62  ;;  %v1978_v13 = vrot.slane %v1977_v56, 2 }
 0x737   : > { %v3220_v50 = vpop.f32.mrf.mxu0 }
 0x738   : > { %v1982_v14 = vadd.f32 %v1970_v11, %v1969_v53  ;;  %v4411_v20 = vadd.f32 %v3219_v46, %v1924_v49  ;;  %v1947_v42 = vrot.slane %v1946_v57, 4  ;;  %v1942_v11 = vrot.slane %v1941_v55, 2 }
 0x739   : > { %v3221_v19 = vpop.f32.mrf.mxu0 }
 0x73a   : > { %v3222_v4 = vadd.f32 %v3221_v19, %v3220_v50  ;;  %v1983_v0 = vrot.slane %v1982_v14, 4  ;;  %v1971_v33 = vmul.f32 %v4411_v20, %v4411_v20  ;;  %v1948_v40 = vadd.f32 %v1947_v42, %v1946_v57 }
 0x73b   : > { %v3223_v24 = vpop.f32.mrf.mxu0  ;;  %v1979_v42 = vadd.f32 %v1978_v13, %v1977_v56 }
 0x73c   : > { %v4413_v28 = vadd.f32 %v3222_v4, %v1927_v32  ;;  %v1984_v41 = vadd.f32 %v1983_v0, %v1982_v14  ;;  %v1949_v3 = vrot.slane %v1948_v40, 2 }
 0x73d   : > { %v3224_v31 = vpop.f32.mrf.mxu0 }
 0x73e   : > { %v1953_v35 = vadd.f32 %v4413_v28, %v4411_v20  ;;  %v1972_v38 = vmul.f32 %v4413_v28, %v4413_v28  ;;  %v3225_v39 = vadd.f32 %v3224_v31, %v3223_v24  ;;  %v1985_v8 = vrot.slane %v1984_v41, 2 }
 0x73f   : > { %v3226_v51 = vpop.f32.mrf.mxu0  ;;  %v1950_v16 = vadd.f32 %v1949_v3, %v1948_v40  ;;  %v1943_v24 = vadd.f32 %v1942_v11, %v1941_v55 }
 0x740   : > { %v1954_v45 = vrot.slane %v1953_v35, 4  ;;  %v1989_v52 = vadd.f32 %v1972_v38, %v1971_v33  ;;  %v4421_v1 = vadd.f32 %v3363_v58, %v3225_v39  ;;  %v1986_v18 = vadd.f32 %v1985_v8, %v1984_v41 }
 0x741   : > { %v3227_v48 = vpop.f32.mrf.mxu0  ;;  %v1951_v30 = vrot.slane %v1950_v16, 1 }
 0x742   : > { %v1955_v44 = vadd.f32 %v1954_v45, %v1953_v35  ;;  %v1990_v61 = vrot.slane %v1989_v52, 4  ;;  %v3228_v49 = vadd.f32 %v3227_v48, %v3226_v51  ;;  %v1973_v57 = vmul.f32 %v4421_v1, %v4421_v1 }
 0x743   : > { %v1987_v35 = vrot.slane %v1986_v18, 1  ;;  %v1944_v51 = vrot.slane %v1943_v24, 1  ;;  %v1952_v40 = vadd.f32 %v1951_v30, %v1950_v16  ;;  %v3543_v30 = vld [vmem:[#allocation7 + $0x170] sm:$0xff]  }
 0x744   : > { %v1991_v10 = vadd.f32 %v1990_v61, %v1989_v52  ;;  %v4423_v53 = vadd.f32 %v3364_v15, %v3228_v49  ;;  %v1956_v46 = vrot.slane %v1955_v44, 2  ;;  %v1980_v52 = vrot.slane %v1979_v42, 1 }
 0x745   : > { %v1988_v61 = vadd.f32 %v1987_v35, %v1986_v18  ;;  %v1945_v55 = vadd.f32 %v1944_v51, %v1943_v24  ;;  %v3546_v35 = vld [vmem:[#allocation7 + $0x168] sm:$0xff]   ;;  %v3549_v51 = vld [vmem:[#allocation7 + $0x160] sm:$0xff]  }
 0x746   : > { %v1992_v50 = vrot.slane %v1991_v10, 2  ;;  %v1960_v14 = vadd.f32 %v4423_v53, %v4421_v1  ;;  %v1974_v58 = vmul.f32 %v4423_v53, %v4423_v53  ;;  %v1957_v32 = vadd.f32 %v1956_v46, %v1955_v44 }
 0x747   : > { %v1981_v8 = vadd.f32 %v1980_v52, %v1979_v42  ;;  %v2007_v13 = vsel %vm803_vm5, %v1952_v40, %v1945_v55  ;;  %v3540_v42 = vld [vmem:[#allocation7 + $0x178] sm:$0xff]   ;;  %v3550_v52 = vld [vmem:[#allocation7 + $0xe0] sm:$0xff]   ;;  %v3558_v55 = vld [vmem:[#allocation7 + $0x148] sm:$0xff]  }
 0x748   : > { %v1961_v19 = vrot.slane %v1960_v14, 4  ;;  %v1996_v4 = vadd.f32 %v1974_v58, %v1973_v57  ;;  %v1993_v15 = vadd.f32 %v1992_v50, %v1991_v10  ;;  %v1958_v38 = vrot.slane %v1957_v32, 1  ;;  %3365 = vmatprep.subr.bf16.mxu1 %v3540_v42  ;;  %v3551_v40 = vld [vmem:[#allocation7 + $0x118] sm:$0xff]  }
 0x749   : > { %v2015_v46 = vsel %vm814_vm6, %v1988_v61, %v1981_v8  ;;  %3366 = vmatpush3.bf16.msra.mxu1 %v3540_v42  ;;  %v3555_v61 = vld [vmem:[#allocation7 + $0x150] sm:$0xff]   ;;  %v3560_v8 = vld [vmem:[#allocation7 + $0x100] sm:$0xff]  }
 0x74a   : > { %v1962_v0 = vadd.f32 %v1961_v19, %v1960_v14  ;;  %v1997_v29 = vrot.slane %v1996_v4, 4  ;;  %v1994_v39 = vrot.slane %v1993_v15, 1  ;;  %v1959_v44 = vadd.f32 %v1958_v38, %v1957_v32  ;;  %3367 = vmatprep.subr.bf16.mxu1 %v3543_v30  ;;  %v3545_v38 = vld [vmem:[#allocation7 + $0x128] sm:$0xff]  }
 0x74c   : > { %v1963_v31 = vrot.slane %v1962_v0, 2  ;;  %v1998_v33 = vadd.f32 %v1997_v29, %v1996_v4  ;;  %v1995_v3 = vadd.f32 %v1994_v39, %v1993_v15  ;;  %v2008_v50 = vsel %vm4720_vm9, %v1959_v44, %v2007_v13  ;;  %v3541_v29 = vld [vmem:[#allocation7 + $0xf8] sm:$0xff]   ;;  %v3547_v39 = vld [vmem:[#allocation7 + $0xe8] sm:$0xff]   ;;  %v3556_v44 = vld [vmem:[#allocation7 + $0xd0] sm:$0xff]  }
 0x74d   : > { %3368 = vmatpush3.bf16.msra.mxu1 %v3543_v30  ;;  %vm4725_vm9 = vcmp.lt.s32.totalorder %v3907_v9, 7 }
 0x74e   : > { %v1964_v45 = vadd.f32 %v1963_v31, %v1962_v0  ;;  %v1999_v48 = vrot.slane %v1998_v33, 2  ;;  %v2016_v57 = vsel %vm4721_vm2, %v1995_v3, %v2015_v46  ;;  %v3539_v0 = vld [vmem:[#allocation7 + $0x138] sm:$0xff]   ;;  %v3542_v31 = vld [vmem:[#allocation7 + $0x130] sm:$0xff]   ;;  %3369 = vmatprep.subr.bf16.mxu1 %v3546_v35  ;;  %v3557_v3 = vld [vmem:[#allocation7 + $0x108] sm:$0xff]  }
 0x74f   : > { %3241 = vmatprep.subr.bf16.mxu0 %v3539_v0  ;;  %vm4726_vm2 = vmmov %vm4725_vm9 }
 0x750   : > { %v1965_v41 = vrot.slane %v1964_v45, 1  ;;  %v2000_v49 = vadd.f32 %v1999_v48, %v1998_v33  ;;  %3242 = vmatpush3.bf16.msra.mxu0 %v3541_v29  ;;  %v3544_v33 = vld [vmem:[#allocation7 + $0xf0] sm:$0xff]   ;;  %v3552_v48 = vld [vmem:[#allocation7 + $0x158] sm:$0xff]  }
 0x751   : > { %3243 = vmatprep.subr.bf16.mxu0 %v3542_v31  ;;  %3370 = vmatpush3.bf16.msra.mxu1 %v3546_v35 }
 0x752   : > { %v1966_v56 = vadd.f32 %v1965_v41, %v1964_v45  ;;  %v2001_v10 = vrot.slane %v2000_v49, 1  ;;  %v3548_v45 = vld [vmem:[#allocation7 + $0x120] sm:$0xff]   ;;  %3371 = vmatprep.subr.bf16.mxu1 %v3549_v51  ;;  %v3553_v41 = vld [vmem:[#allocation7 + $0xd8] sm:$0xff]  }
 0x754   : > { %v2002_v11 = vadd.f32 %v2001_v10, %v2000_v49  ;;  %v2009_v14 = vsel %vm4722_vm1, %v1966_v56, %v2008_v50  ;;  %3244 = vmatpush3.bf16.msra.mxu0 %v3544_v33  ;;  %v3554_v49 = vld [vmem:[#allocation7 + $0x110] sm:$0xff]   ;;  %v3559_v56 = vld [vmem:[#allocation7 + $0xc8] sm:$0xff]   ;;  %v3561_v10 = vld [vmem:[#allocation7 + $0x140] sm:$0xff]  }
 0x755   : > { %3245 = vmatprep.subr.bf16.mxu0 %v3545_v38  ;;  %3372 = vmatpush3.bf16.msra.mxu1 %v3549_v51  ;;  %vm4727_vm1 = vmmov %vm4726_vm2 }
 0x756   : > { %v2017_v58 = vsel %vm4723_vm8, %v2002_v11, %v2016_v57  ;;  %3373 = vmatprep.subr.bf16.mxu1 %v3552_v48  ;;  %v3562_v11 = vld [vmem:[#allocation7 + $0xc0] sm:$0xff]   ;;  %vm4728_vm8 = vmmov %vm4727_vm1 }
 0x757   : > { %v2019_v16 = vsel %vm4724_vm10, %v2009_v14, %v2017_v58  ;;  %vm4729_vm10 = vmmov %vm4727_vm1 }
 0x758   : > { %2020 = vrot.lane.b32.xlu0 %v2019_v16, %s3737_s18  ;;  %3246 = vmatpush3.bf16.msra.mxu0 %v3547_v39 }
 0x759   : > { %3247 = vmatprep.subr.bf16.mxu0 %v3548_v45  ;;  %3374 = vmatpush3.bf16.msra.mxu1 %v3552_v48 }
 0x75a   : > { %3375 = vmatprep.subr.bf16.mxu1 %v3555_v61 }
 0x75c   : > { %3248 = vmatpush3.bf16.msra.mxu0 %v3550_v52 }
 0x75d   : > { %3249 = vmatprep.subr.bf16.mxu0 %v3551_v40  ;;  %3376 = vmatpush3.bf16.msra.mxu1 %v3555_v61 }
 0x75e   : > { %3377 = vmatprep.subr.bf16.mxu1 %v3558_v55 }
 0x760   : > { %3250 = vmatpush3.bf16.msra.mxu0 %v3553_v41 }
 0x761   : > { %3251 = vmatprep.subr.bf16.mxu0 %v3554_v49  ;;  %3378 = vmatpush3.bf16.msra.mxu1 %v3558_v55 }
 0x762   : > { %3379 = vmatprep.subr.bf16.mxu1 %v3561_v10 }
 0x764   : > { %3252 = vmatpush3.bf16.msra.mxu0 %v3556_v44 }
 0x765   : > { %3253 = vmatprep.subr.bf16.mxu0 %v3557_v3  ;;  %3380 = vmatpush3.bf16.msra.mxu1 %v3561_v10 }
 0x768   : > { %3254 = vmatpush3.bf16.msra.mxu0 %v3559_v56 }
 0x769   : > { %3255 = vmatprep.subr.bf16.mxu0 %v3560_v8 }
 0x76c   : > { %3256 = vmatpush3.bf16.msra.mxu0 %v3562_v11 }
 0x7ca   : > { %v2021_v18 = vpop.permute.xlu0 %2020 }
 0x7cb   : > { %v2022_v19 = vadd.f32 %v2021_v18, %v2019_v16 }
 0x7cd   : > { %2023 = vrot.lane.b32.xlu1 %v2022_v19, %s3738_s20 }
 0x83f   : > { %v2024_v4 = vpop.permute.xlu1 %2023 }
 0x840   : > { %v2025_v32 = vadd.f32 %v2024_v4, %v2022_v19 }
 0x842   : > { %2026 = vrot.lane.b32.xlu0 %v2025_v32, %s3739_s25 }
 0x8b4   : > { %v2027_v15 = vpop.permute.xlu0 %2026 }
 0x8b5   : > { %v2028_v24 = vadd.f32 %v2027_v15, %v2025_v32 }
 0x8b7   : > { %2029 = vrot.lane.b32.xlu1 %v2028_v24, %s3740_s27 }
 0x929   : > { %v2030_v13 = vpop.permute.xlu1 %2029 }
 0x92a   : > { %v2031_v46 = vadd.f32 %v2030_v13, %v2028_v24 }
 0x92c   : > { %v2032_v50 = vmul.f32 0.00390625, %v2031_v46 }
 0x92e   : > { %v2033_v57 = vmul.f32 %v2032_v50, %v2032_v50  ;;  %v2047_v18 = vrot.slane %v2032_v50, %v4147_v47 }
 0x930   : > { %v2035_v14 = vrot.slane %v2033_v57, 4  ;;  %v2048_v19 = vcombine.high %v2047_v18, %v2047_v18  ;;  %v2055_v4 = vrot.slane %v2047_v18, %v4147_v47 }
 0x932   : > { %v2037_v58 = vsub.f32 %v2032_v50, %v2035_v14  ;;  %v2062_v32 = vrot.slane %v2048_v19, %v4147_v47  ;;  %v2063_v42 = vcombine.high %v2055_v4, %v2055_v4  ;;  %v2068_v30 = vrot.slane %v2055_v4, %v4153_v54 }
 0x934   : > { %v2038_v16 = vadd.f32 1e-05, %v2037_v58  ;;  %v2064_v29 = vcombine.high %v2062_v32, %v2062_v32  ;;  %v2072_v31 = vrot.slane %v2062_v32, %v4153_v54  ;;  %v2076_v33 = vrot.slane %v2063_v42, %v4153_v54 }
 0x935   : > { %v2085_v45 = vsub.f32 %v4395_v2, %v2068_v30  ;;  %v2086_v49 = vsub.f32 %v4391_v59, %v2068_v30 }
 0x936   : > { %3567 = vrsqrt.f32 %v2038_v16  ;;  %v2080_v39 = vrot.slane %v2064_v29, %v4153_v54  ;;  %v2087_v40 = vsub.f32 %v4393_v62, %v2072_v31  ;;  %v2088_v41 = vsub.f32 %v4397_v7, %v2072_v31 }
 0x937   : > { %v2089_v61 = vsub.f32 %v4411_v20, %v2076_v33  ;;  %v2090_v8 = vsub.f32 %v4413_v28, %v2076_v33 }
 0x938   : > { %v2091_v2 = vsub.f32 %v4421_v1, %v2080_v39  ;;  %v2092_v10 = vsub.f32 %v4423_v53, %v2080_v39 }
 0x943   : > { %v3568_v15 = vpop.eup %3567 }
 0x944   : > { %v2094_v0 = vcombine.high %v3568_v15, %v3568_v15 }
 0x946   : > { %v2101_v24 = vrot.slane %v2094_v0, %v4147_v47 }
 0x948   : > { %v2102_v35 = vcombine.high %v2101_v24, %v2101_v24  ;;  %v2109_v38 = vrot.slane %v2101_v24, %v4147_v47 }
 0x94a   : > { %v2116_v51 = vrot.slane %v2102_v35, %v4147_v47  ;;  %v2117_v52 = vcombine.high %v2109_v38, %v2109_v38  ;;  %v2122_v48 = vrot.slane %v2109_v38, %v4153_v54 }
 0x94c   : > { %v2118_v44 = vcombine.high %v2116_v51, %v2116_v51  ;;  %v2126_v3 = vrot.slane %v2116_v51, %v4153_v54  ;;  %v2130_v55 = vrot.slane %v2117_v52, %v4153_v54  ;;  %v2139_v56 = vmul.f32 %v2122_v48, %v2085_v45 }
 0x94d   : > { %v2140_v11 = vmul.f32 %v2122_v48, %v2086_v49 }
 0x94e   : > { %v2134_v62 = vrot.slane %v2118_v44, %v4153_v54  ;;  %v2141_v7 = vmul.f32 %v2126_v3, %v2087_v40  ;;  %v2142_v13 = vmul.f32 %v2126_v3, %v2088_v41  ;;  %v2143_v20 = vmul.f32 %v2130_v55, %v2089_v61 }
 0x94f   : > { %v2147_v46 = vmax.f32 %v2139_v56, 0.0  ;;  %v2148_v59 = vmax.f32 %v2140_v11, 0.0  ;;  %v2144_v50 = vmul.f32 %v2130_v55, %v2090_v8 }
 0x950   : > { %v2145_v57 = vmul.f32 %v2134_v62, %v2091_v2  ;;  %v2146_v14 = vmul.f32 %v2134_v62, %v2092_v10  ;;  %v2149_v58 = vmax.f32 %v2141_v7, 0.0  ;;  %v2150_v16 = vmax.f32 %v2142_v13, 0.0 }
 0x951   : > { %v2151_v18 = vmax.f32 %v2143_v20, 0.0  ;;  %v2204_v19 = vrot.slane %v2147_v46, 7  ;;  %v2205_v28 = vrot.slane %v2148_v59, 7  ;;  %v2256_v4 = vpack.c.bf16 %v2148_v59, %v2147_v46 }
 0x952   : > { %v2154_v1 = vmax.f32 %v2146_v14, 0.0  ;;  %v2231_v32 = vrot.slane %v2150_v16, 1  ;;  %v2228_v53 = vrot.slane %v2147_v46, 1  ;;  %v2229_v15 = vrot.slane %v2148_v59, 1 }
 0x953   : > { %2440 = vmatprep.mubr.bf16.mxu0 %v2256_v4  ;;  %v2230_v42 = vrot.slane %v2149_v58, 1  ;;  %v2232_v0 = vrot.slane %v2151_v18, 1  ;;  %v2152_v29 = vmax.f32 %v2144_v50, 0.0  ;;  %v2218_v24 = vsel %vm407_vm0, %v2204_v19, %v2205_v28 }
 0x954   : > { %v2211_v30 = vrot.slane %v2154_v1, 7  ;;  %v2242_v31 = vsel %vm4725_vm9, %v2228_v53, %v2229_v15  ;;  %v2153_v33 = vmax.f32 %v2145_v57, 0.0  ;;  %v2257_v49 = vpack.c.bf16 %v2150_v16, %v2149_v58  ;;  %vm4730_vm9 = vmmov %vm4727_vm1 }
 0x955   : > { %v2240_v35 = vsel %vm4726_vm2, %v2230_v42, %v2231_v32  ;;  %v2241_v38 = vsel %vm4727_vm1, %v2229_v15, %v2230_v42  ;;  %v2239_v39 = vsel %vm4728_vm8, %v2231_v32, %v2232_v0  ;;  %v2233_v51 = vrot.slane %v2152_v29, 1  ;;  %vm4731_vm2 = vmmov %vm4727_vm1 }
 0x956   : > { %v2219_v45 = vsel %vm407_vm0, %v2211_v30, %v2204_v19  ;;  %v3064_v52 = vpack.c.bf16 %v2241_v38, %v2242_v31  ;;  %v3067_v48 = vpack.c.bf16 %v2239_v39, %v2240_v35  ;;  %v2234_v40 = vrot.slane %v2153_v33, 1 }
 0x957   : > { %v3052_v41 = vpack.c.bf16 %v2218_v24, %v2219_v45  ;;  %v2238_v61 = vsel %vm4729_vm10, %v2232_v0, %v2233_v51  ;;  %v2235_v3 = vrot.slane %v2154_v1, 1  ;;  %v2206_v55 = vrot.slane %v2149_v58, 7 }
 0x958   : > { %3381 = vmatprep.mubr.msk.bf16.mxu1 %vm3970_vm7, %v3064_v52  ;;  %v2237_v44 = vsel %vm4730_vm9, %v2233_v51, %v2234_v40  ;;  %v2207_v56 = vrot.slane %v2150_v16, 7  ;;  %vm4732_vm7 = vmmov %vm4727_vm1  ;;  %v2258_v62 = vpack.c.bf16 %v2152_v29, %v2151_v18  ;;  %v2208_v7 = vrot.slane %v2151_v18, 7 }
 0x959   : > { %3382 = vmatmul.mubr.msk.bf16.vlgmr.msra.gmra.mxu1 %vm4008_vm12, %v3067_v48  ;;  %3053 = vmatmul.mubr.msk.bf16.vlgmr.msra.gmra.mxu0 %vm3996_vm11, %v3052_v41  ;;  %v3070_v8 = vpack.c.bf16 %v2237_v44, %v2238_v61  ;;  %v2236_v60 = vsel %vm4731_vm2, %v2234_v40, %v2235_v3  ;;  %v2243_v2 = vsel %vm4732_vm7, %v2235_v3, %v2228_v53  ;;  %v2209_v13 = vrot.slane %v2152_v29, 7 }
 0x95a   : > { %2448 = vmatprep.mubr.bf16.mxu0 %v2257_v49  ;;  %v2216_v10 = vsel %vm407_vm0, %v2206_v55, %v2207_v56  ;;  %v2217_v12 = vsel %vm407_vm0, %v2205_v28, %v2206_v55  ;;  %v3073_v11 = vpack.c.bf16 %v2243_v2, %v2236_v60  ;;  %v2215_v20 = vsel %vm407_vm0, %v2207_v56, %v2208_v7 }
 0x95b   : > { %3385 = vmatprep.mubr.msk.bf16.mxu1 %vm4029_vm14, %v3070_v8  ;;  %v3055_v5 = vpack.c.bf16 %v2216_v10, %v2217_v12  ;;  %v2214_v23 = vsel %vm407_vm0, %v2208_v7, %v2209_v13  ;;  %v2259_v59 = vpack.c.bf16 %v2154_v1, %v2153_v33  ;;  %v2210_v50 = vrot.slane %v2153_v33, 7 }
 0x95c   : > { %v3058_v46 = vpack.c.bf16 %v2214_v23, %v2215_v20  ;;  %vm4734_vm11 = vcmask 1046534   ;;  %vm4735_vm12 = vcmask 1043459   ;;  %vm4737_vm14 = vcmask 1043456  }
 0x95d   : > { %v2212_v26 = vsel %vm407_vm0, %v2210_v50, %v2211_v30  ;;  %v2213_v17 = vsel %vm407_vm0, %v2209_v13, %v2210_v50  ;;  %vm4733_vm0 = vcmask 1042434  }
 0x95e   : > { %v3061_v57 = vpack.c.bf16 %v2212_v26, %v2213_v17 }
 0x961   : > { %3386 = vmatmul.mubr.msk.bf16.gmra.mxu1 %vm4039_vm15, %v3073_v11  ;;  %3056 = vmatmul.mubr.msk.bf16.gmra.mxu0 %vm4019_vm13, %v3055_v5  ;;  %vm4736_vm13 = vcmask 1047559  }
 0x962   : > { %2456 = vmatprep.mubr.bf16.mxu0 %v2258_v62 }
 0x969   : > { %3059 = vmatmul.mubr.msk.bf16.gmra.mxu0 %vm4065_vm3, %v3058_v46 }
 0x96a   : > { %2464 = vmatprep.mubr.bf16.mxu0 %v2259_v59 }
 0x971   : > { %3062 = vmatmul.mubr.msk.bf16.gmra.mxu0 %vm4081_vm4, %v3061_v57 }
 0xa19   : > { %v3383_v14 = vpop.f32.mrf.mxu1  ;;  %v3257_v58 = vpop.f32.mrf.mxu0 }
 0xa1b   : > { %v2507_v16 = vpop.f32.mrf.mxu1  ;;  %v3258_v18 = vpop.f32.mrf.mxu0 }
 0xa1c   : > { %v3259_v42 = vadd.f32 %v3258_v18, %v3257_v58 }
 0xa1d   : > { %v3384_v19 = vpop.f32.mrf.mxu1  ;;  %v3260_v28 = vpop.f32.mrf.mxu0 }
 0xa1e   : > { %v4516_v31 = vadd.f32 %v3259_v42, %v2507_v16 }
 0xa1f   : > { %v3261_v4 = vpop.f32.mrf.mxu0  ;;  %v2510_v36 = vpop.f32.mrf.mxu1 }
 0xa20   : > { %v3262_v32 = vadd.f32 %v3261_v4, %v3260_v28  ;;  %v2566_v48 = vmul.f32 %v4516_v31, %v4516_v31 }
 0xa21   : > { %v3263_v1 = vpop.f32.mrf.mxu0  ;;  %v3387_v0 = vpop.f32.mrf.mxu1 }
 0xa22   : > { %v4512_v29 = vadd.f32 %v3262_v32, %v2510_v36 }
 0xa23   : > { %v3264_v53 = vpop.f32.mrf.mxu0  ;;  %v2523_v33 = vpop.f32.mrf.mxu1 }
 0xa24   : > { %v3265_v15 = vadd.f32 %v3264_v53, %v3263_v1  ;;  %v2567_v39 = vmul.f32 %v4512_v29, %v4512_v29  ;;  %v2538_v3 = vadd.f32 %v4512_v29, %v4516_v31 }
 0xa25   : > { %v3266_v9 = vpop.f32.mrf.mxu0  ;;  %v3388_v40 = vpop.f32.mrf.mxu1 }
 0xa26   : > { %v4514_v43 = vadd.f32 %v3383_v14, %v3265_v15  ;;  %v2574_v55 = vadd.f32 %v2567_v39, %v2566_v48  ;;  %v2539_v62 = vrot.slane %v2538_v3, 4 }
 0xa27   : > { %v3267_v30 = vpop.f32.mrf.mxu0  ;;  %v2526_v2 = vpop.f32.mrf.mxu1 }
 0xa28   : > { %v3268_v24 = vadd.f32 %v3267_v30, %v3266_v9  ;;  %v2568_v45 = vmul.f32 %v4514_v43, %v4514_v43  ;;  %v2575_v7 = vrot.slane %v2574_v55, 4  ;;  %v2540_v58 = vadd.f32 %v2539_v62, %v2538_v3 }
 0xa29   : > { %v3269_v35 = vpop.f32.mrf.mxu0 }
 0xa2a   : > { %v4518_v38 = vadd.f32 %v3384_v19, %v3268_v24  ;;  %v2576_v16 = vadd.f32 %v2575_v7, %v2574_v55  ;;  %v2541_v42 = vrot.slane %v2540_v58, 2 }
 0xa2b   : > { %v3270_v51 = vpop.f32.mrf.mxu0 }
 0xa2c   : > { %v2569_v52 = vmul.f32 %v4518_v38, %v4518_v38  ;;  %v3271_v41 = vadd.f32 %v3270_v51, %v3269_v35  ;;  %v2545_v49 = vadd.f32 %v4518_v38, %v4514_v43  ;;  %v2577_v9 = vrot.slane %v2576_v16, 2 }
 0xa2d   : > { %v3272_v61 = vpop.f32.mrf.mxu0 }
 0xa2e   : > { %v2581_v44 = vadd.f32 %v2569_v52, %v2568_v45  ;;  %v4532_v8 = vadd.f32 %v3271_v41, %v2523_v33  ;;  %v2546_v12 = vrot.slane %v2545_v49, 4  ;;  %v2542_v41 = vadd.f32 %v2541_v42, %v2540_v58 }
 0xa2f   : > { %v3273_v56 = vpop.f32.mrf.mxu0 }
 0xa30   : > { %v3274_v60 = vadd.f32 %v3273_v56, %v3272_v61  ;;  %v2582_v11 = vrot.slane %v2581_v44, 4  ;;  %v2570_v23 = vmul.f32 %v4532_v8, %v4532_v8  ;;  %v2547_v26 = vadd.f32 %v2546_v12, %v2545_v49 }
 0xa31   : > { %v3275_v10 = vpop.f32.mrf.mxu0  ;;  %v2578_v61 = vadd.f32 %v2577_v9, %v2576_v16  ;;  %v2543_v12 = vrot.slane %v2542_v41, 1 }
 0xa32   : > { %v4534_v5 = vadd.f32 %v3274_v60, %v2526_v2  ;;  %v2583_v17 = vadd.f32 %v2582_v11, %v2581_v44  ;;  %v2548_v1 = vrot.slane %v2547_v26, 2 }
 0xa33   : > { %v3276_v13 = vpop.f32.mrf.mxu0  ;;  %v2579_v62 = vrot.slane %v2578_v61, 1 }
 0xa34   : > { %v2552_v20 = vadd.f32 %v4534_v5, %v4532_v8  ;;  %v2571_v46 = vmul.f32 %v4534_v5, %v4534_v5  ;;  %v3277_v59 = vadd.f32 %v3276_v13, %v3275_v10  ;;  %v2584_v32 = vrot.slane %v2583_v17, 2 }
 0xa35   : > { %v3278_v50 = vpop.f32.mrf.mxu0  ;;  %v2549_v39 = vadd.f32 %v2548_v1, %v2547_v26  ;;  %v2544_v26 = vadd.f32 %v2543_v12, %v2542_v41 }
 0xa36   : > { %v2553_v57 = vrot.slane %v2552_v20, 4  ;;  %v2588_v14 = vadd.f32 %v2571_v46, %v2570_v23  ;;  %v4542_v4 = vadd.f32 %v3387_v0, %v3277_v59  ;;  %v2585_v51 = vadd.f32 %v2584_v32, %v2583_v17 }
 0xa37   : > { %v3279_v18 = vpop.f32.mrf.mxu0  ;;  %v2550_v3 = vrot.slane %v2549_v39, 1 }
 0xa38   : > { %v2554_v19 = vadd.f32 %v2553_v57, %v2552_v20  ;;  %v2589_v28 = vrot.slane %v2588_v14, 4  ;;  %v3280_v36 = vadd.f32 %v3279_v18, %v3278_v50  ;;  %v2572_v33 = vmul.f32 %v4542_v4, %v4542_v4 }
 0xa39   : > { %v2586_v60 = vrot.slane %v2585_v51, 1  ;;  %v2551_v13 = vadd.f32 %v2550_v3, %v2549_v39  ;;  %v2580_v57 = vadd.f32 %v2579_v62, %v2578_v61 }
 0xa3a   : > { %v2590_v53 = vadd.f32 %v2589_v28, %v2588_v14  ;;  %v4544_v15 = vadd.f32 %v3388_v40, %v3280_v36  ;;  %v2555_v30 = vrot.slane %v2554_v19, 2 }
 0xa3b   : > { %v2587_v20 = vadd.f32 %v2586_v60, %v2585_v51  ;;  %v2606_v16 = vsel %vm803_vm5, %v2551_v13, %v2544_v26 }
 0xa3c   : > { %v2591_v24 = vrot.slane %v2590_v53, 2  ;;  %v2559_v35 = vadd.f32 %v4544_v15, %v4542_v4  ;;  %v2573_v0 = vmul.f32 %v4544_v15, %v4544_v15  ;;  %v2556_v48 = vadd.f32 %v2555_v30, %v2554_v19 }
 0xa3d   : > { %v2614_v18 = vsel %vm814_vm6, %v2587_v20, %v2580_v57 }
 0xa3e   : > { %v2560_v45 = vrot.slane %v2559_v35, 4  ;;  %v2595_v52 = vadd.f32 %v2573_v0, %v2572_v33  ;;  %v2592_v40 = vadd.f32 %v2591_v24, %v2590_v53  ;;  %v2557_v2 = vrot.slane %v2556_v48, 1 }
 0xa40   : > { %v2561_v49 = vadd.f32 %v2560_v45, %v2559_v35  ;;  %v2596_v44 = vrot.slane %v2595_v52, 4  ;;  %v2593_v10 = vrot.slane %v2592_v40, 1  ;;  %v2558_v59 = vadd.f32 %v2557_v2, %v2556_v48 }
 0xa42   : > { %v2562_v55 = vrot.slane %v2561_v49, 2  ;;  %v2597_v56 = vadd.f32 %v2596_v44, %v2595_v52  ;;  %v2594_v50 = vadd.f32 %v2593_v10, %v2592_v40  ;;  %v2607_v19 = vsel %vm4733_vm0, %v2558_v59, %v2606_v16 }
 0xa44   : > { %v2563_v11 = vadd.f32 %v2562_v55, %v2561_v49  ;;  %v2598_v7 = vrot.slane %v2597_v56, 2  ;;  %v2615_v28 = vsel %vm4734_vm11, %v2594_v50, %v2614_v18 }
 0xa46   : > { %v2564_v23 = vrot.slane %v2563_v11, 1  ;;  %v2599_v46 = vadd.f32 %v2598_v7, %v2597_v56 }
 0xa48   : > { %v2565_v17 = vadd.f32 %v2564_v23, %v2563_v11  ;;  %v2600_v14 = vrot.slane %v2599_v46, 1 }
 0xa4a   : > { %v2601_v58 = vadd.f32 %v2600_v14, %v2599_v46  ;;  %v2608_v36 = vsel %vm4735_vm12, %v2565_v17, %v2607_v19 }
 0xa4c   : > { %v2616_v1 = vsel %vm4736_vm13, %v2601_v58, %v2615_v28 }
 0xa4d   : > { %v2618_v32 = vsel %vm4737_vm14, %v2608_v36, %v2616_v1 }
 0xa4e   : > { %2619 = vrot.lane.b32.xlu0 %v2618_v32, %s3737_s18 }
 0xac0   : > { %v2620_v53 = vpop.permute.xlu0 %2619 }
 0xac1   : > { %v2621_v42 = vadd.f32 %v2620_v53, %v2618_v32 }
 0xac3   : > { %2622 = vrot.lane.b32.xlu1 %v2621_v42, %s3738_s20 }
 0xb35   : > { %v2623_v9 = vpop.permute.xlu1 %2622 }
 0xb36   : > { %v2624_v30 = vadd.f32 %v2623_v9, %v2621_v42 }
 0xb38   : > { %2625 = vrot.lane.b32.xlu0 %v2624_v30, %s3739_s25 }
 0xbaa   : > { %v2626_v24 = vpop.permute.xlu0 %2625 }
 0xbab   : > { %v2627_v33 = vadd.f32 %v2626_v24, %v2624_v30 }
 0xbad   : > { %2628 = vrot.lane.b32.xlu1 %v2627_v33, %s3740_s27 }
 0xc1f   : > { %v2629_v35 = vpop.permute.xlu1 %2628 }
 0xc20   : > { %v2630_v0 = vadd.f32 %v2629_v35, %v2627_v33 }
 0xc22   : > { %v2631_v39 = vmul.f32 0.00390625, %v2630_v0 }
 0xc24   : > { %v2632_v51 = vmul.f32 %v2631_v39, %v2631_v39  ;;  %v2646_v40 = vrot.slane %v2631_v39, %v4147_v47 }
 0xc26   : > { %v2634_v45 = vrot.slane %v2632_v51, 4  ;;  %v2647_v41 = vcombine.high %v2646_v40, %v2646_v40  ;;  %v2654_v61 = vrot.slane %v2646_v40, %v4147_v47 }
 0xc28   : > { %v2636_v52 = vsub.f32 %v2631_v39, %v2634_v45  ;;  %v2661_v49 = vrot.slane %v2647_v41, %v4147_v47  ;;  %v2662_v3 = vcombine.high %v2654_v61, %v2654_v61  ;;  %v2667_v60 = vrot.slane %v2654_v61, %v4153_v54 }
 0xc2a   : > { %v2637_v48 = vadd.f32 1e-05, %v2636_v52  ;;  %v2663_v56 = vcombine.high %v2661_v49, %v2661_v49  ;;  %v2671_v10 = vrot.slane %v2661_v49, %v4153_v54  ;;  %v2675_v12 = vrot.slane %v2662_v3, %v4153_v54 }
 0xc2b   : > { %v2684_v13 = vsub.f32 %v4516_v31, %v2667_v60  ;;  %v2685_v59 = vsub.f32 %v4512_v29, %v2667_v60 }
 0xc2c   : > { %3569 = vrsqrt.f32 %v2637_v48  ;;  %v2679_v7 = vrot.slane %v2663_v56, %v4153_v54  ;;  %v2686_v50 = vsub.f32 %v4514_v43, %v2671_v10  ;;  %v2687_v26 = vsub.f32 %v4518_v38, %v2671_v10 }
 0xc2d   : > { %v2688_v17 = vsub.f32 %v4532_v8, %v2675_v12 }
 0xc2e   : > { %v2690_v16 = vsub.f32 %v4542_v4, %v2679_v7  ;;  %v2691_v29 = vsub.f32 %v4544_v15, %v2679_v7 }
 0xc39   : > { %v3570_v44 = vpop.eup %3569 }
 0xc3a   : > { %v2693_v55 = vcombine.high %v3570_v44, %v3570_v44 }
 0xc3c   : > { %v2700_v2 = vrot.slane %v2693_v55, %v4147_v47 }
 0xc3e   : > { %v2701_v11 = vcombine.high %v2700_v2, %v2700_v2  ;;  %v2708_v62 = vrot.slane %v2700_v2, %v4147_v47 }
 0xc40   : > { %v2715_v23 = vrot.slane %v2701_v11, %v4147_v47  ;;  %v2716_v20 = vcombine.high %v2708_v62, %v2708_v62  ;;  %v2721_v46 = vrot.slane %v2708_v62, %v4153_v54  ;;  %v2689_v47 = vsub.f32 %v4534_v5, %v2675_v12 }
 0xc42   : > { %v2717_v57 = vcombine.high %v2715_v23, %v2715_v23  ;;  %v2725_v14 = vrot.slane %v2715_v23, %v4153_v54  ;;  %v2729_v31 = vrot.slane %v2716_v20, %v4153_v54  ;;  %v2738_v58 = vmul.f32 %v2721_v46, %v2684_v13 }
 0xc43   : > { %v2739_v18 = vmul.f32 %v2721_v46, %v2685_v59 }
 0xc44   : > { %v2733_v43 = vrot.slane %v2717_v57, %v4153_v54  ;;  %v2740_v19 = vmul.f32 %v2725_v14, %v2686_v50  ;;  %v2741_v38 = vmul.f32 %v2725_v14, %v2687_v26  ;;  %v2742_v28 = vmul.f32 %v2729_v31, %v2688_v17 }
 0xc45   : > { %v2743_v8 = vmul.f32 %v2729_v31, %v2689_v47  ;;  %v2746_v36 = vadd.f32 %v2738_v58, %v4296_v22  ;;  %v2747_v1 = vadd.f32 %v2739_v18, %v4299_v21 }
 0xc46   : > { %v2744_v5 = vmul.f32 %v2733_v43, %v2690_v16  ;;  %v2745_v32 = vmul.f32 %v2733_v43, %v2691_v29  ;;  %v2748_v4 = vadd.f32 %v2740_v19, %v4302_v27  ;;  %v2749_v15 = vadd.f32 %v2741_v38, %v4305_v6 }
 0xc47   : > { %v2750_v54 = vadd.f32 %v2742_v28, %v4308_v25  ;;  %v2751_v53 = vadd.f32 %v2743_v8, %v4311_v63  ;;  %2754 = vst [vmem:[%s218_s29] sm:$0xff] %v2746_v36  ;;  %2755 = vst [vmem:[%s218_s29 + $0x8] sm:$0xff] %v2747_v1 }
 0xc48   : > { %v2752_v22 = vadd.f32 %v2744_v5, %v4316_v34  ;;  %v2753_v21 = vadd.f32 %v2745_v32, %v4319_v37  ;;  %2756 = vst [vmem:[%s218_s29 + $0x10] sm:$0xff] %v2748_v4  ;;  %2757 = vst [vmem:[%s218_s29 + $0x18] sm:$0xff] %v2749_v15 }
 0xc49   : > { %2758 = vst [vmem:[%s218_s29 + $0x20] sm:$0xff] %v2750_v54  ;;  %2759 = vst [vmem:[%s218_s29 + $0x28] sm:$0xff] %v2751_v53 }
 0xc4a   : > { %2760 = vst [vmem:[%s218_s29 + $0x30] sm:$0xff] %v2752_v22  ;;  %2761 = vst [vmem:[%s218_s29 + $0x38] sm:$0xff] %v2753_v21 }
 0xc4b   : > { %3672 = shalt.err (!%p3669_p9)
}
 0xc4c   : > { %s3673_s4 = scalar_lea.hbm %s4597_s17, 1024  ;;  %s3677_s20 = scalar_lea.hbm %s4648_s3, 2048 }
 0xc4d   : > { %p3674_p13 = scmp.ne.s32.totalorder %s4597_s17, %s3673_s4  ;;  %p3678_p4 = scmp.lt.s32.totalorder %s4597_s17, %s4648_s3 }
 0xc4e   : > { %p3679_p8 = scmp.lt.s32.totalorder %s3677_s20, %s3673_s4 }
 0xc4f   : > { %p3675_p5 = pnand %p3674_p13, %p4738_p10 }
 0xc50   : > { %p3680_p3 = por %p3679_p8, %p3678_p4 }
 0xc51   : > { %p3676_p0 = pneg %p3675_p5 }
 0xc53   : > { %p3681_p11 = pnand %p3680_p3, %p3676_p0 }
 0xc55   : > { %3684 = shalt.err (!%p3681_p11)
}
 0xc56   : > { %s3743_s28 = smov 128  }
 0xc57   : > { %3399 = dma.vmem_to_hbm [thread:$0]  (%p4738_p10), %s4601_s8, 1024, %s4597_s17, %s2763_s21, %s3743_s28, %s3743_s28, %s3737_s18  }
 0xc58 PF: > { %s2792_s29 = sand.u32 1, %s3715_s12   ;;  %p4739_p1 = scmp.ne.s32.totalorder %s4660_s19, 0 }
 0xc59   : > { %p4740_p2 = scmp.ge.s32.totalorder %s3727_s15, 2  ;;  %s2793_s16 = scalar_lea.sflag [#allocation4], %s2792_s29 }
 0xc5b   : > { %p3413_p6 = pnand %p4740_p2, %p4739_p1 }
 0xc5d   : > { %p3414_p12 = pneg %p3413_p6 }
 0xc5f   : > { %3710 = dma.done.wait (%p3414_p12), %s2793_s16, 1024  }
 0xc60   : > { %3712 = vsyncadd (%p3414_p12), %s2793_s16, 4294966272  ;;  %p17_p7 = scmp.ge.s32.totalorder %s3836_s7, 4   ;;  %s4741_s12 = smov %s3719_s13 }
 0xc61   : > { %s4742_s13 = smov %s3723_s14  ;;  %s4743_s14 = smov %s3852_s11 }
 0xc62   : > { %s4744_s15 = smov %s3836_s7  ;;  %19 = sbr.rel (!%p17_p7) target bundleno = 6 (0x6), region = 87 }
 0xc67   :  { %2798 = vsyncpa [#allocation3], 1 }
 0xc68   :  { %2800 = vsyncpa [#allocation3 + $0x1], 1 }
 0xc69   :  { %2801 = vsyncpa [#allocation6], 1 }
 0xc6a   :  { %2802 = vsyncpa [#allocation4], 1 }
 0xc6b   :  { %2804 = vsyncpa [#allocation4 + $0x1], 1 }

</bundles_post_ra>
